<compile_context>
chip_gen: v7x
topology: tpu7x:2x2x1
jax: 0.10.0
libtpu: 0.0.40
codegen_flags: <defaults>
</compile_context>

<pallas_src>
import functools

import jax
import jax.numpy as jnp
from jax import lax
from jax.experimental import pallas as pl
from jax.experimental.pallas import tpu as pltpu


# ------------------------- kernel 1: fused depthwise --------------------------

def _dw_kernel(x_ref, w7_ref, b7_ref, w3_ref, b3_ref, o_ref,
               pad7_ref, pad3_ref, *, H, W):
    """One (batch, channel) plane: dw7x7(+BN1) -> dw3x3(+BN2) -> ReLU."""
    c = pl.program_id(1)

    # ---- 7x7 depthwise conv (+ folded BN1) ----
    pad7_ref[...] = jnp.zeros_like(pad7_ref)          # zero border + interior
    pad7_ref[3:3 + H, 3:3 + W] = x_ref[...].astype(jnp.float32)
    xp = pad7_ref[...]

    base7 = c * 49
    acc = w7_ref[base7] * lax.slice(xp, (0, 0), (H, W))   # init from first tap
    for i in range(7):
        for j in range(7):
            if i == 0 and j == 0:
                continue
            acc = acc + w7_ref[base7 + i * 7 + j] * lax.slice(
                xp, (i, j), (i + H, j + W))
    y1 = acc + b7_ref[c]                                   # bias added once

    # ---- 3x3 depthwise conv (+ folded BN2) + ReLU ----
    pad3_ref[...] = jnp.zeros_like(pad3_ref)
    pad3_ref[1:1 + H, 1:1 + W] = y1
    yp = pad3_ref[...]

    base3 = c * 9
    acc2 = w3_ref[base3] * lax.slice(yp, (0, 0), (H, W))
    for i in range(3):
        for j in range(3):
            if i == 0 and j == 0:
                continue
            acc2 = acc2 + w3_ref[base3 + i * 3 + j] * lax.slice(
                yp, (i, j), (i + H, j + W))
    o_ref[...] = jnp.maximum(acc2 + b3_ref[c], 0.0).astype(o_ref.dtype)


# ---------------- kernel 2: pointwise matmul + sigmoid + residual -------------

def _pw_kernel(y2_ref, x_ref, wp_ref, bp_ref, o_ref):
    """Lane-dense stage: (C,C) @ (C,H*W) on the MXU, sigmoid gate, residual add."""
    y2 = y2_ref[...]                                            # (C, HW) f32
    acc = jnp.dot(wp_ref[...], y2, preferred_element_type=jnp.float32)
    gate = jax.nn.sigmoid(acc + bp_ref[...])                    # (C,1) broadcast
    xv = x_ref[...].astype(jnp.float32)
    o_ref[...] = (gate * xv + xv).astype(o_ref.dtype)


# --------------------------------- wrapper ------------------------------------

def spatial_attention(x, folded_params):
    """x: (N, C, H, W) float32. folded_params from fold_params()."""
    N, C, H, W = x.shape
    HW = H * W
    w7, b7, w3, b3, wp, bp = folded_params
    smem = pl.BlockSpec(memory_space=pltpu.MemorySpace.SMEM)

    # Stage 1: fused depthwise convs, grid over (batch, channel).
    y2 = pl.pallas_call(
        functools.partial(_dw_kernel, H=H, W=W),
        out_shape=jax.ShapeDtypeStruct((N, C, H, W), jnp.float32),
        grid=(N, C),
        in_specs=[
            pl.BlockSpec((None, None, H, W), lambda n, c: (n, c, 0, 0)),
            smem, smem, smem, smem,
        ],
        out_specs=pl.BlockSpec((None, None, H, W), lambda n, c: (n, c, 0, 0)),
        scratch_shapes=[
            pltpu.VMEM((H + 6, W + 6), jnp.float32),   # 7x7 padded plane
            pltpu.VMEM((H + 2, W + 2), jnp.float32),   # 3x3 padded plane
        ],
        compiler_params=pltpu.CompilerParams(
            dimension_semantics=("parallel", "parallel")),
    )(x, w7, b7, w3, b3)

    # Stage 2: lane-dense pointwise conv (MXU) + sigmoid + residual gate.
    x_flat = x.reshape(N, C, HW)
    y2_flat = y2.reshape(N, C, HW)
    out_flat = pl.pallas_call(
        _pw_kernel,
        out_shape=jax.ShapeDtypeStruct((N, C, HW), x.dtype),
        grid=(N,),
        in_specs=[
            pl.BlockSpec((None, C, HW), lambda n: (n, 0, 0)),
            pl.BlockSpec((None, C, HW), lambda n: (n, 0, 0)),
            pl.BlockSpec((C, C), lambda n: (0, 0)),
            pl.BlockSpec((C, 1), lambda n: (0, 0)),
        ],
        out_specs=pl.BlockSpec((None, C, HW), lambda n: (n, 0, 0)),
        compiler_params=pltpu.CompilerParams(dimension_semantics=("parallel",)),
    )(y2_flat, x_flat, wp, bp)

    return out_flat.reshape(N, C, H, W)


# ----------------------- parameter setup (plain JAX glue) ---------------------

def init_params(key, C):
    ks = jax.random.split(key, 18)
    n = lambda k, s: jax.random.normal(k, s, jnp.float32)
    p = {
        "conv7_w": 0.1 * n(ks[0], (C, 1, 7, 7)), "conv7_b": 0.1 * n(ks[1], (C,)),
        "bn1_g": 1.0 + 0.1 * n(ks[2], (C,)), "bn1_b": 0.1 * n(ks[3], (C,)),
        "bn1_m": 0.1 * n(ks[4], (C,)), "bn1_v": 0.5 + jnp.abs(n(ks[5], (C,))),
        "conv3_w": 0.1 * n(ks[6], (C, 1, 3, 3)), "conv3_b": 0.1 * n(ks[7], (C,)),
        "bn2_g": 1.0 + 0.1 * n(ks[8], (C,)), "bn2_b": 0.1 * n(ks[9], (C,)),
        "bn2_m": 0.1 * n(ks[10], (C,)), "bn2_v": 0.5 + jnp.abs(n(ks[11], (C,))),
        "conv1_w": 0.1 * n(ks[12], (C, C, 1, 1)), "conv1_b": 0.1 * n(ks[13], (C,)),
        "bn3_g": 1.0 + 0.1 * n(ks[14], (C,)), "bn3_b": 0.1 * n(ks[15], (C,)),
        "bn3_m": 0.1 * n(ks[16], (C,)), "bn3_v": 0.5 + jnp.abs(n(ks[17], (C,))),
    }
    return p


def _bn_fold(g, b, m, v, eps=1e-5):
    a = g / jnp.sqrt(v + eps)
    return a, b - a * m


def fold_params(p):
    """Fold eval-mode BatchNorm into the preceding convs."""
    C = p["conv7_b"].shape[0]
    a1, c1 = _bn_fold(p["bn1_g"], p["bn1_b"], p["bn1_m"], p["bn1_v"])
    a2, c2 = _bn_fold(p["bn2_g"], p["bn2_b"], p["bn2_m"], p["bn2_v"])
    a3, c3 = _bn_fold(p["bn3_g"], p["bn3_b"], p["bn3_m"], p["bn3_v"])
    w7 = (a1[:, None, None, None] * p["conv7_w"]).reshape(C * 49)   # SMEM scalars
    b7 = a1 * p["conv7_b"] + c1
    w3 = (a2[:, None, None, None] * p["conv3_w"]).reshape(C * 9)    # SMEM scalars
    b3 = a2 * p["conv3_b"] + c2
    wp = a3[:, None] * p["conv1_w"].reshape(C, C)                   # (C, C) VMEM tile
    bp = (a3 * p["conv1_b"] + c3).reshape(C, 1)                     # (C, 1) VMEM tile
    return w7, b7, w3, b3, wp, bp


# ----------------------------- pure-JAX reference -----------------------------

def reference(x, p, eps=1e-5):
    C = x.shape[1]
    dn = ("NCHW", "OIHW", "NCHW")

    def bn(y, g, b, m, v):
        g, b, m, v = (t[None, :, None, None] for t in (g, b, m, v))
        return g * (y - m) / jnp.sqrt(v + eps) + b

    y = lax.conv_general_dilated(x, p["conv7_w"], (1, 1), ((3, 3), (3, 3)),
                                 dimension_numbers=dn, feature_group_count=C,
                                 precision=lax.Precision.HIGHEST)
    y = bn(y + p["conv7_b"][None, :, None, None],
           p["bn1_g"], p["bn1_b"], p["bn1_m"], p["bn1_v"])
    y = lax.conv_general_dilated(y, p["conv3_w"], (1, 1), ((1, 1), (1, 1)),
                                 dimension_numbers=dn, feature_group_count=C,
                                 precision=lax.Precision.HIGHEST)
    y = bn(y + p["conv3_b"][None, :, None, None],
           p["bn2_g"], p["bn2_b"], p["bn2_m"], p["bn2_v"])
    y = jnp.maximum(y, 0.0)
    y = lax.conv_general_dilated(y, p["conv1_w"], (1, 1), ((0, 0), (0, 0)),
                                 dimension_numbers=dn,
                                 precision=lax.Precision.HIGHEST)
    y = bn(y + p["conv1_b"][None, :, None, None],
           p["bn3_g"], p["bn3_b"], p["bn3_m"], p["bn3_v"])
    w = jax.nn.sigmoid(y)
    return w * x + x


# ----------------------------------- main --------------------------------------

if __name__ == "__main__":
    N, C, H, W = 2, 4, 16, 16
    kx, kp = jax.random.split(jax.random.PRNGKey(0))
    x = jax.random.normal(kx, (N, C, H, W), jnp.float32)

    params = init_params(kp, C)
    folded = fold_params(params)

    out = jax.block_until_ready(spatial_attention(x, folded))

    ref = reference(x, params)
    assert out.shape == x.shape and out.dtype == x.dtype
    if not jnp.allclose(out, ref, rtol=2e-3, atol=2e-3):
        raise AssertionError("Pallas kernel does not match reference")
    print("KERNEL_OK")
</pallas_src>

<mosaic_0001>
module attributes {stable_mosaic.version = 11 : i64} {
  func.func @_dw_kernel(%arg0: i32, %arg1: i32, %arg2: memref<1x1x16x16xf32, #tpu.memory_space<vmem>>, %arg3: memref<196xf32, #tpu.memory_space<smem>>, %arg4: memref<4xf32, #tpu.memory_space<smem>>, %arg5: memref<36xf32, #tpu.memory_space<smem>>, %arg6: memref<4xf32, #tpu.memory_space<smem>>, %arg7: memref<1x1x16x16xf32, #tpu.memory_space<vmem>>, %arg8: memref<22x22xf32, #tpu.memory_space<vmem>>, %arg9: memref<18x18xf32, #tpu.memory_space<vmem>>) attributes {dimension_semantics = [#tpu.dimension_semantics<parallel>, #tpu.dimension_semantics<parallel>], iteration_bounds = array<i64: 2, 4>, scalar_prefetch = 0 : i64, scratch_operands = 2 : i64, tpu.core_type = #tpu.core_type<tc>, window_params = [{transform_indices = @transform_0, window_bounds = array<i64: 1, 1, 16, 16>}, {transform_indices = @transform_1, window_bounds = array<i64: 196>}, {transform_indices = @transform_2, window_bounds = array<i64: 4>}, {transform_indices = @transform_3, window_bounds = array<i64: 36>}, {transform_indices = @transform_4, window_bounds = array<i64: 4>}, {transform_indices = @transform_5, window_bounds = array<i64: 1, 1, 16, 16>}]} {
    %cst = arith.constant 0.000000e+00 : f32
    %0 = vector.broadcast %cst : f32 to vector<22x22xf32>
    %c0 = arith.constant 0 : index
    %c0_0 = arith.constant 0 : index
    %1 = vector.load %arg8[%c0, %c0_0] : memref<22x22xf32, #tpu.memory_space<vmem>>, vector<22x22xf32>
    tpu.vector_store %arg8[%c0, %c0_0], %0 {strides = array<i32>} : memref<22x22xf32, #tpu.memory_space<vmem>>, vector<22x22xf32>,
    %c0_1 = arith.constant 0 : index
    %c0_2 = arith.constant 0 : index
    %c0_3 = arith.constant 0 : index
    %c0_4 = arith.constant 0 : index
    %2 = vector.load %arg2[%c0_1, %c0_2, %c0_3, %c0_4] : memref<1x1x16x16xf32, #tpu.memory_space<vmem>>, vector<1x1x16x16xf32>
    %3 = vector.shape_cast %2 : vector<1x1x16x16xf32> to vector<16x16xf32>
    %c3 = arith.constant 3 : index
    %c3_5 = arith.constant 3 : index
    %4 = vector.load %arg8[%c3, %c3_5] : memref<22x22xf32, #tpu.memory_space<vmem>>, vector<16x16xf32>
    tpu.vector_store %arg8[%c3, %c3_5], %3 {strides = array<i32>} : memref<22x22xf32, #tpu.memory_space<vmem>>, vector<16x16xf32>,
    %c0_6 = arith.constant 0 : index
    %c0_7 = arith.constant 0 : index
    %5 = vector.load %arg8[%c0_6, %c0_7] : memref<22x22xf32, #tpu.memory_space<vmem>>, vector<22x22xf32>
    %c49_i32 = arith.constant 49 : i32
    %6 = arith.muli %arg1, %c49_i32 : i32
    %7 = arith.index_cast %6 : i32 to index
    %8 = memref.load %arg3[%7] : memref<196xf32, #tpu.memory_space<smem>>
    %9 = vector.extract_strided_slice %5 {offsets = [0, 0], sizes = [16, 16], strides = [1, 1]} : vector<22x22xf32> to vector<16x16xf32>
    %10 = vector.broadcast %8 : f32 to vector<16x16xf32>
    %11 = arith.mulf %10, %9 : vector<16x16xf32>
    %c0_i32 = arith.constant 0 : i32
    %12 = arith.addi %6, %c0_i32 : i32
    %c1_i32 = arith.constant 1 : i32
    %13 = arith.addi %12, %c1_i32 : i32
    %14 = arith.index_cast %13 : i32 to index
    %15 = memref.load %arg3[%14] : memref<196xf32, #tpu.memory_space<smem>>
    %16 = vector.extract_strided_slice %5 {offsets = [0, 1], sizes = [16, 16], strides = [1, 1]} : vector<22x22xf32> to vector<16x16xf32>
    %17 = vector.broadcast %15 : f32 to vector<16x16xf32>
    %18 = arith.mulf %17, %16 : vector<16x16xf32>
    %19 = arith.addf %11, %18 : vector<16x16xf32>
    %c0_i32_8 = arith.constant 0 : i32
    %20 = arith.addi %6, %c0_i32_8 : i32
    %c2_i32 = arith.constant 2 : i32
    %21 = arith.addi %20, %c2_i32 : i32
    %22 = arith.index_cast %21 : i32 to index
    %23 = memref.load %arg3[%22] : memref<196xf32, #tpu.memory_space<smem>>
    %24 = vector.extract_strided_slice %5 {offsets = [0, 2], sizes = [16, 16], strides = [1, 1]} : vector<22x22xf32> to vector<16x16xf32>
    %25 = vector.broadcast %23 : f32 to vector<16x16xf32>
    %26 = arith.mulf %25, %24 : vector<16x16xf32>
    %27 = arith.addf %19, %26 : vector<16x16xf32>
    %c0_i32_9 = arith.constant 0 : i32
    %28 = arith.addi %6, %c0_i32_9 : i32
    %c3_i32 = arith.constant 3 : i32
    %29 = arith.addi %28, %c3_i32 : i32
    %30 = arith.index_cast %29 : i32 to index
    %31 = memref.load %arg3[%30] : memref<196xf32, #tpu.memory_space<smem>>
    %32 = vector.extract_strided_slice %5 {offsets = [0, 3], sizes = [16, 16], strides = [1, 1]} : vector<22x22xf32> to vector<16x16xf32>
    %33 = vector.broadcast %31 : f32 to vector<16x16xf32>
    %34 = arith.mulf %33, %32 : vector<16x16xf32>
    %35 = arith.addf %27, %34 : vector<16x16xf32>
    %c0_i32_10 = arith.constant 0 : i32
    %36 = arith.addi %6, %c0_i32_10 : i32
    %c4_i32 = arith.constant 4 : i32
    %37 = arith.addi %36, %c4_i32 : i32
    %38 = arith.index_cast %37 : i32 to index
    %39 = memref.load %arg3[%38] : memref<196xf32, #tpu.memory_space<smem>>
    %40 = vector.extract_strided_slice %5 {offsets = [0, 4], sizes = [16, 16], strides = [1, 1]} : vector<22x22xf32> to vector<16x16xf32>
    %41 = vector.broadcast %39 : f32 to vector<16x16xf32>
    %42 = arith.mulf %41, %40 : vector<16x16xf32>
    %43 = arith.addf %35, %42 : vector<16x16xf32>
    %c0_i32_11 = arith.constant 0 : i32
    %44 = arith.addi %6, %c0_i32_11 : i32
    %c5_i32 = arith.constant 5 : i32
    %45 = arith.addi %44, %c5_i32 : i32
    %46 = arith.index_cast %45 : i32 to index
    %47 = memref.load %arg3[%46] : memref<196xf32, #tpu.memory_space<smem>>
    %48 = vector.extract_strided_slice %5 {offsets = [0, 5], sizes = [16, 16], strides = [1, 1]} : vector<22x22xf32> to vector<16x16xf32>
    %49 = vector.broadcast %47 : f32 to vector<16x16xf32>
    %50 = arith.mulf %49, %48 : vector<16x16xf32>
    %51 = arith.addf %43, %50 : vector<16x16xf32>
    %c0_i32_12 = arith.constant 0 : i32
    %52 = arith.addi %6, %c0_i32_12 : i32
    %c6_i32 = arith.constant 6 : i32
    %53 = arith.addi %52, %c6_i32 : i32
    %54 = arith.index_cast %53 : i32 to index
    %55 = memref.load %arg3[%54] : memref<196xf32, #tpu.memory_space<smem>>
    %56 = vector.extract_strided_slice %5 {offsets = [0, 6], sizes = [16, 16], strides = [1, 1]} : vector<22x22xf32> to vector<16x16xf32>
    %57 = vector.broadcast %55 : f32 to vector<16x16xf32>
    %58 = arith.mulf %57, %56 : vector<16x16xf32>
    %59 = arith.addf %51, %58 : vector<16x16xf32>
    %c7_i32 = arith.constant 7 : i32
    %60 = arith.addi %6, %c7_i32 : i32
    %c0_i32_13 = arith.constant 0 : i32
    %61 = arith.addi %60, %c0_i32_13 : i32
    %62 = arith.index_cast %61 : i32 to index
    %63 = memref.load %arg3[%62] : memref<196xf32, #tpu.memory_space<smem>>
    %64 = vector.extract_strided_slice %5 {offsets = [1, 0], sizes = [16, 16], strides = [1, 1]} : vector<22x22xf32> to vector<16x16xf32>
    %65 = vector.broadcast %63 : f32 to vector<16x16xf32>
    %66 = arith.mulf %65, %64 : vector<16x16xf32>
    %67 = arith.addf %59, %66 : vector<16x16xf32>
    %c7_i32_14 = arith.constant 7 : i32
    %68 = arith.addi %6, %c7_i32_14 : i32
    %c1_i32_15 = arith.constant 1 : i32
    %69 = arith.addi %68, %c1_i32_15 : i32
    %70 = arith.index_cast %69 : i32 to index
    %71 = memref.load %arg3[%70] : memref<196xf32, #tpu.memory_space<smem>>
    %72 = vector.extract_strided_slice %5 {offsets = [1, 1], sizes = [16, 16], strides = [1, 1]} : vector<22x22xf32> to vector<16x16xf32>
    %73 = vector.broadcast %71 : f32 to vector<16x16xf32>
    %74 = arith.mulf %73, %72 : vector<16x16xf32>
    %75 = arith.addf %67, %74 : vector<16x16xf32>
    %c7_i32_16 = arith.constant 7 : i32
    %76 = arith.addi %6, %c7_i32_16 : i32
    %c2_i32_17 = arith.constant 2 : i32
    %77 = arith.addi %76, %c2_i32_17 : i32
    %78 = arith.index_cast %77 : i32 to index
    %79 = memref.load %arg3[%78] : memref<196xf32, #tpu.memory_space<smem>>
    %80 = vector.extract_strided_slice %5 {offsets = [1, 2], sizes = [16, 16], strides = [1, 1]} : vector<22x22xf32> to vector<16x16xf32>
    %81 = vector.broadcast %79 : f32 to vector<16x16xf32>
    %82 = arith.mulf %81, %80 : vector<16x16xf32>
    %83 = arith.addf %75, %82 : vector<16x16xf32>
    %c7_i32_18 = arith.constant 7 : i32
    %84 = arith.addi %6, %c7_i32_18 : i32
    %c3_i32_19 = arith.constant 3 : i32
    %85 = arith.addi %84, %c3_i32_19 : i32
    %86 = arith.index_cast %85 : i32 to index
    %87 = memref.load %arg3[%86] : memref<196xf32, #tpu.memory_space<smem>>
    %88 = vector.extract_strided_slice %5 {offsets = [1, 3], sizes = [16, 16], strides = [1, 1]} : vector<22x22xf32> to vector<16x16xf32>
    %89 = vector.broadcast %87 : f32 to vector<16x16xf32>
    %90 = arith.mulf %89, %88 : vector<16x16xf32>
    %91 = arith.addf %83, %90 : vector<16x16xf32>
    %c7_i32_20 = arith.constant 7 : i32
    %92 = arith.addi %6, %c7_i32_20 : i32
    %c4_i32_21 = arith.constant 4 : i32
    %93 = arith.addi %92, %c4_i32_21 : i32
    %94 = arith.index_cast %93 : i32 to index
    %95 = memref.load %arg3[%94] : memref<196xf32, #tpu.memory_space<smem>>
    %96 = vector.extract_strided_slice %5 {offsets = [1, 4], sizes = [16, 16], strides = [1, 1]} : vector<22x22xf32> to vector<16x16xf32>
    %97 = vector.broadcast %95 : f32 to vector<16x16xf32>
    %98 = arith.mulf %97, %96 : vector<16x16xf32>
    %99 = arith.addf %91, %98 : vector<16x16xf32>
    %c7_i32_22 = arith.constant 7 : i32
    %100 = arith.addi %6, %c7_i32_22 : i32
    %c5_i32_23 = arith.constant 5 : i32
    %101 = arith.addi %100, %c5_i32_23 : i32
    %102 = arith.index_cast %101 : i32 to index
    %103 = memref.load %arg3[%102] : memref<196xf32, #tpu.memory_space<smem>>
    %104 = vector.extract_strided_slice %5 {offsets = [1, 5], sizes = [16, 16], strides = [1, 1]} : vector<22x22xf32> to vector<16x16xf32>
    %105 = vector.broadcast %103 : f32 to vector<16x16xf32>
    %106 = arith.mulf %105, %104 : vector<16x16xf32>
    %107 = arith.addf %99, %106 : vector<16x16xf32>
    %c7_i32_24 = arith.constant 7 : i32
    %108 = arith.addi %6, %c7_i32_24 : i32
    %c6_i32_25 = arith.constant 6 : i32
    %109 = arith.addi %108, %c6_i32_25 : i32
    %110 = arith.index_cast %109 : i32 to index
    %111 = memref.load %arg3[%110] : memref<196xf32, #tpu.memory_space<smem>>
    %112 = vector.extract_strided_slice %5 {offsets = [1, 6], sizes = [16, 16], strides = [1, 1]} : vector<22x22xf32> to vector<16x16xf32>
    %113 = vector.broadcast %111 : f32 to vector<16x16xf32>
    %114 = arith.mulf %113, %112 : vector<16x16xf32>
    %115 = arith.addf %107, %114 : vector<16x16xf32>
    %c14_i32 = arith.constant 14 : i32
    %116 = arith.addi %6, %c14_i32 : i32
    %c0_i32_26 = arith.constant 0 : i32
    %117 = arith.addi %116, %c0_i32_26 : i32
    %118 = arith.index_cast %117 : i32 to index
    %119 = memref.load %arg3[%118] : memref<196xf32, #tpu.memory_space<smem>>
    %120 = vector.extract_strided_slice %5 {offsets = [2, 0], sizes = [16, 16], strides = [1, 1]} : vector<22x22xf32> to vector<16x16xf32>
    %121 = vector.broadcast %119 : f32 to vector<16x16xf32>
    %122 = arith.mulf %121, %120 : vector<16x16xf32>
    %123 = arith.addf %115, %122 : vector<16x16xf32>
    %c14_i32_27 = arith.constant 14 : i32
    %124 = arith.addi %6, %c14_i32_27 : i32
    %c1_i32_28 = arith.constant 1 : i32
    %125 = arith.addi %124, %c1_i32_28 : i32
    %126 = arith.index_cast %125 : i32 to index
    %127 = memref.load %arg3[%126] : memref<196xf32, #tpu.memory_space<smem>>
    %128 = vector.extract_strided_slice %5 {offsets = [2, 1], sizes = [16, 16], strides = [1, 1]} : vector<22x22xf32> to vector<16x16xf32>
    %129 = vector.broadcast %127 : f32 to vector<16x16xf32>
    %130 = arith.mulf %129, %128 : vector<16x16xf32>
    %131 = arith.addf %123, %130 : vector<16x16xf32>
    %c14_i32_29 = arith.constant 14 : i32
    %132 = arith.addi %6, %c14_i32_29 : i32
    %c2_i32_30 = arith.constant 2 : i32
    %133 = arith.addi %132, %c2_i32_30 : i32
    %134 = arith.index_cast %133 : i32 to index
    %135 = memref.load %arg3[%134] : memref<196xf32, #tpu.memory_space<smem>>
    %136 = vector.extract_strided_slice %5 {offsets = [2, 2], sizes = [16, 16], strides = [1, 1]} : vector<22x22xf32> to vector<16x16xf32>
    %137 = vector.broadcast %135 : f32 to vector<16x16xf32>
    %138 = arith.mulf %137, %136 : vector<16x16xf32>
    %139 = arith.addf %131, %138 : vector<16x16xf32>
    %c14_i32_31 = arith.constant 14 : i32
    %140 = arith.addi %6, %c14_i32_31 : i32
    %c3_i32_32 = arith.constant 3 : i32
    %141 = arith.addi %140, %c3_i32_32 : i32
    %142 = arith.index_cast %141 : i32 to index
    %143 = memref.load %arg3[%142] : memref<196xf32, #tpu.memory_space<smem>>
    %144 = vector.extract_strided_slice %5 {offsets = [2, 3], sizes = [16, 16], strides = [1, 1]} : vector<22x22xf32> to vector<16x16xf32>
    %145 = vector.broadcast %143 : f32 to vector<16x16xf32>
    %146 = arith.mulf %145, %144 : vector<16x16xf32>
    %147 = arith.addf %139, %146 : vector<16x16xf32>
    %c14_i32_33 = arith.constant 14 : i32
    %148 = arith.addi %6, %c14_i32_33 : i32
    %c4_i32_34 = arith.constant 4 : i32
    %149 = arith.addi %148, %c4_i32_34 : i32
    %150 = arith.index_cast %149 : i32 to index
    %151 = memref.load %arg3[%150] : memref<196xf32, #tpu.memory_space<smem>>
    %152 = vector.extract_strided_slice %5 {offsets = [2, 4], sizes = [16, 16], strides = [1, 1]} : vector<22x22xf32> to vector<16x16xf32>
    %153 = vector.broadcast %151 : f32 to vector<16x16xf32>
    %154 = arith.mulf %153, %152 : vector<16x16xf32>
    %155 = arith.addf %147, %154 : vector<16x16xf32>
    %c14_i32_35 = arith.constant 14 : i32
    %156 = arith.addi %6, %c14_i32_35 : i32
    %c5_i32_36 = arith.constant 5 : i32
    %157 = arith.addi %156, %c5_i32_36 : i32
    %158 = arith.index_cast %157 : i32 to index
    %159 = memref.load %arg3[%158] : memref<196xf32, #tpu.memory_space<smem>>
    %160 = vector.extract_strided_slice %5 {offsets = [2, 5], sizes = [16, 16], strides = [1, 1]} : vector<22x22xf32> to vector<16x16xf32>
    %161 = vector.broadcast %159 : f32 to vector<16x16xf32>
    %162 = arith.mulf %161, %160 : vector<16x16xf32>
    %163 = arith.addf %155, %162 : vector<16x16xf32>
    %c14_i32_37 = arith.constant 14 : i32
    %164 = arith.addi %6, %c14_i32_37 : i32
    %c6_i32_38 = arith.constant 6 : i32
    %165 = arith.addi %164, %c6_i32_38 : i32
    %166 = arith.index_cast %165 : i32 to index
    %167 = memref.load %arg3[%166] : memref<196xf32, #tpu.memory_space<smem>>
    %168 = vector.extract_strided_slice %5 {offsets = [2, 6], sizes = [16, 16], strides = [1, 1]} : vector<22x22xf32> to vector<16x16xf32>
    %169 = vector.broadcast %167 : f32 to vector<16x16xf32>
    %170 = arith.mulf %169, %168 : vector<16x16xf32>
    %171 = arith.addf %163, %170 : vector<16x16xf32>
    %c21_i32 = arith.constant 21 : i32
    %172 = arith.addi %6, %c21_i32 : i32
    %c0_i32_39 = arith.constant 0 : i32
    %173 = arith.addi %172, %c0_i32_39 : i32
    %174 = arith.index_cast %173 : i32 to index
    %175 = memref.load %arg3[%174] : memref<196xf32, #tpu.memory_space<smem>>
    %176 = vector.extract_strided_slice %5 {offsets = [3, 0], sizes = [16, 16], strides = [1, 1]} : vector<22x22xf32> to vector<16x16xf32>
    %177 = vector.broadcast %175 : f32 to vector<16x16xf32>
    %178 = arith.mulf %177, %176 : vector<16x16xf32>
    %179 = arith.addf %171, %178 : vector<16x16xf32>
    %c21_i32_40 = arith.constant 21 : i32
    %180 = arith.addi %6, %c21_i32_40 : i32
    %c1_i32_41 = arith.constant 1 : i32
    %181 = arith.addi %180, %c1_i32_41 : i32
    %182 = arith.index_cast %181 : i32 to index
    %183 = memref.load %arg3[%182] : memref<196xf32, #tpu.memory_space<smem>>
    %184 = vector.extract_strided_slice %5 {offsets = [3, 1], sizes = [16, 16], strides = [1, 1]} : vector<22x22xf32> to vector<16x16xf32>
    %185 = vector.broadcast %183 : f32 to vector<16x16xf32>
    %186 = arith.mulf %185, %184 : vector<16x16xf32>
    %187 = arith.addf %179, %186 : vector<16x16xf32>
    %c21_i32_42 = arith.constant 21 : i32
    %188 = arith.addi %6, %c21_i32_42 : i32
    %c2_i32_43 = arith.constant 2 : i32
    %189 = arith.addi %188, %c2_i32_43 : i32
    %190 = arith.index_cast %189 : i32 to index
    %191 = memref.load %arg3[%190] : memref<196xf32, #tpu.memory_space<smem>>
    %192 = vector.extract_strided_slice %5 {offsets = [3, 2], sizes = [16, 16], strides = [1, 1]} : vector<22x22xf32> to vector<16x16xf32>
    %193 = vector.broadcast %191 : f32 to vector<16x16xf32>
    %194 = arith.mulf %193, %192 : vector<16x16xf32>
    %195 = arith.addf %187, %194 : vector<16x16xf32>
    %c21_i32_44 = arith.constant 21 : i32
    %196 = arith.addi %6, %c21_i32_44 : i32
    %c3_i32_45 = arith.constant 3 : i32
    %197 = arith.addi %196, %c3_i32_45 : i32
    %198 = arith.index_cast %197 : i32 to index
    %199 = memref.load %arg3[%198] : memref<196xf32, #tpu.memory_space<smem>>
    %200 = vector.extract_strided_slice %5 {offsets = [3, 3], sizes = [16, 16], strides = [1, 1]} : vector<22x22xf32> to vector<16x16xf32>
    %201 = vector.broadcast %199 : f32 to vector<16x16xf32>
    %202 = arith.mulf %201, %200 : vector<16x16xf32>
    %203 = arith.addf %195, %202 : vector<16x16xf32>
    %c21_i32_46 = arith.constant 21 : i32
    %204 = arith.addi %6, %c21_i32_46 : i32
    %c4_i32_47 = arith.constant 4 : i32
    %205 = arith.addi %204, %c4_i32_47 : i32
    %206 = arith.index_cast %205 : i32 to index
    %207 = memref.load %arg3[%206] : memref<196xf32, #tpu.memory_space<smem>>
    %208 = vector.extract_strided_slice %5 {offsets = [3, 4], sizes = [16, 16], strides = [1, 1]} : vector<22x22xf32> to vector<16x16xf32>
    %209 = vector.broadcast %207 : f32 to vector<16x16xf32>
    %210 = arith.mulf %209, %208 : vector<16x16xf32>
    %211 = arith.addf %203, %210 : vector<16x16xf32>
    %c21_i32_48 = arith.constant 21 : i32
    %212 = arith.addi %6, %c21_i32_48 : i32
    %c5_i32_49 = arith.constant 5 : i32
    %213 = arith.addi %212, %c5_i32_49 : i32
    %214 = arith.index_cast %213 : i32 to index
    %215 = memref.load %arg3[%214] : memref<196xf32, #tpu.memory_space<smem>>
    %216 = vector.extract_strided_slice %5 {offsets = [3, 5], sizes = [16, 16], strides = [1, 1]} : vector<22x22xf32> to vector<16x16xf32>
    %217 = vector.broadcast %215 : f32 to vector<16x16xf32>
    %218 = arith.mulf %217, %216 : vector<16x16xf32>
    %219 = arith.addf %211, %218 : vector<16x16xf32>
    %c21_i32_50 = arith.constant 21 : i32
    %220 = arith.addi %6, %c21_i32_50 : i32
    %c6_i32_51 = arith.constant 6 : i32
    %221 = arith.addi %220, %c6_i32_51 : i32
    %222 = arith.index_cast %221 : i32 to index
    %223 = memref.load %arg3[%222] : memref<196xf32, #tpu.memory_space<smem>>
    %224 = vector.extract_strided_slice %5 {offsets = [3, 6], sizes = [16, 16], strides = [1, 1]} : vector<22x22xf32> to vector<16x16xf32>
    %225 = vector.broadcast %223 : f32 to vector<16x16xf32>
    %226 = arith.mulf %225, %224 : vector<16x16xf32>
    %227 = arith.addf %219, %226 : vector<16x16xf32>
    %c28_i32 = arith.constant 28 : i32
    %228 = arith.addi %6, %c28_i32 : i32
    %c0_i32_52 = arith.constant 0 : i32
    %229 = arith.addi %228, %c0_i32_52 : i32
    %230 = arith.index_cast %229 : i32 to index
    %231 = memref.load %arg3[%230] : memref<196xf32, #tpu.memory_space<smem>>
    %232 = vector.extract_strided_slice %5 {offsets = [4, 0], sizes = [16, 16], strides = [1, 1]} : vector<22x22xf32> to vector<16x16xf32>
    %233 = vector.broadcast %231 : f32 to vector<16x16xf32>
    %234 = arith.mulf %233, %232 : vector<16x16xf32>
    %235 = arith.addf %227, %234 : vector<16x16xf32>
    %c28_i32_53 = arith.constant 28 : i32
    %236 = arith.addi %6, %c28_i32_53 : i32
    %c1_i32_54 = arith.constant 1 : i32
    %237 = arith.addi %236, %c1_i32_54 : i32
    %238 = arith.index_cast %237 : i32 to index
    %239 = memref.load %arg3[%238] : memref<196xf32, #tpu.memory_space<smem>>
    %240 = vector.extract_strided_slice %5 {offsets = [4, 1], sizes = [16, 16], strides = [1, 1]} : vector<22x22xf32> to vector<16x16xf32>
    %241 = vector.broadcast %239 : f32 to vector<16x16xf32>
    %242 = arith.mulf %241, %240 : vector<16x16xf32>
    %243 = arith.addf %235, %242 : vector<16x16xf32>
    %c28_i32_55 = arith.constant 28 : i32
    %244 = arith.addi %6, %c28_i32_55 : i32
    %c2_i32_56 = arith.constant 2 : i32
    %245 = arith.addi %244, %c2_i32_56 : i32
    %246 = arith.index_cast %245 : i32 to index
    %247 = memref.load %arg3[%246] : memref<196xf32, #tpu.memory_space<smem>>
    %248 = vector.extract_strided_slice %5 {offsets = [4, 2], sizes = [16, 16], strides = [1, 1]} : vector<22x22xf32> to vector<16x16xf32>
    %249 = vector.broadcast %247 : f32 to vector<16x16xf32>
    %250 = arith.mulf %249, %248 : vector<16x16xf32>
    %251 = arith.addf %243, %250 : vector<16x16xf32>
    %c28_i32_57 = arith.constant 28 : i32
    %252 = arith.addi %6, %c28_i32_57 : i32
    %c3_i32_58 = arith.constant 3 : i32
    %253 = arith.addi %252, %c3_i32_58 : i32
    %254 = arith.index_cast %253 : i32 to index
    %255 = memref.load %arg3[%254] : memref<196xf32, #tpu.memory_space<smem>>
    %256 = vector.extract_strided_slice %5 {offsets = [4, 3], sizes = [16, 16], strides = [1, 1]} : vector<22x22xf32> to vector<16x16xf32>
    %257 = vector.broadcast %255 : f32 to vector<16x16xf32>
    %258 = arith.mulf %257, %256 : vector<16x16xf32>
    %259 = arith.addf %251, %258 : vector<16x16xf32>
    %c28_i32_59 = arith.constant 28 : i32
    %260 = arith.addi %6, %c28_i32_59 : i32
    %c4_i32_60 = arith.constant 4 : i32
    %261 = arith.addi %260, %c4_i32_60 : i32
    %262 = arith.index_cast %261 : i32 to index
    %263 = memref.load %arg3[%262] : memref<196xf32, #tpu.memory_space<smem>>
    %264 = vector.extract_strided_slice %5 {offsets = [4, 4], sizes = [16, 16], strides = [1, 1]} : vector<22x22xf32> to vector<16x16xf32>
    %265 = vector.broadcast %263 : f32 to vector<16x16xf32>
    %266 = arith.mulf %265, %264 : vector<16x16xf32>
    %267 = arith.addf %259, %266 : vector<16x16xf32>
    %c28_i32_61 = arith.constant 28 : i32
    %268 = arith.addi %6, %c28_i32_61 : i32
    %c5_i32_62 = arith.constant 5 : i32
    %269 = arith.addi %268, %c5_i32_62 : i32
    %270 = arith.index_cast %269 : i32 to index
    %271 = memref.load %arg3[%270] : memref<196xf32, #tpu.memory_space<smem>>
    %272 = vector.extract_strided_slice %5 {offsets = [4, 5], sizes = [16, 16], strides = [1, 1]} : vector<22x22xf32> to vector<16x16xf32>
    %273 = vector.broadcast %271 : f32 to vector<16x16xf32>
    %274 = arith.mulf %273, %272 : vector<16x16xf32>
    %275 = arith.addf %267, %274 : vector<16x16xf32>
    %c28_i32_63 = arith.constant 28 : i32
    %276 = arith.addi %6, %c28_i32_63 : i32
    %c6_i32_64 = arith.constant 6 : i32
    %277 = arith.addi %276, %c6_i32_64 : i32
    %278 = arith.index_cast %277 : i32 to index
    %279 = memref.load %arg3[%278] : memref<196xf32, #tpu.memory_space<smem>>
    %280 = vector.extract_strided_slice %5 {offsets = [4, 6], sizes = [16, 16], strides = [1, 1]} : vector<22x22xf32> to vector<16x16xf32>
    %281 = vector.broadcast %279 : f32 to vector<16x16xf32>
    %282 = arith.mulf %281, %280 : vector<16x16xf32>
    %283 = arith.addf %275, %282 : vector<16x16xf32>
    %c35_i32 = arith.constant 35 : i32
    %284 = arith.addi %6, %c35_i32 : i32
    %c0_i32_65 = arith.constant 0 : i32
    %285 = arith.addi %284, %c0_i32_65 : i32
    %286 = arith.index_cast %285 : i32 to index
    %287 = memref.load %arg3[%286] : memref<196xf32, #tpu.memory_space<smem>>
    %288 = vector.extract_strided_slice %5 {offsets = [5, 0], sizes = [16, 16], strides = [1, 1]} : vector<22x22xf32> to vector<16x16xf32>
    %289 = vector.broadcast %287 : f32 to vector<16x16xf32>
    %290 = arith.mulf %289, %288 : vector<16x16xf32>
    %291 = arith.addf %283, %290 : vector<16x16xf32>
    %c35_i32_66 = arith.constant 35 : i32
    %292 = arith.addi %6, %c35_i32_66 : i32
    %c1_i32_67 = arith.constant 1 : i32
    %293 = arith.addi %292, %c1_i32_67 : i32
    %294 = arith.index_cast %293 : i32 to index
    %295 = memref.load %arg3[%294] : memref<196xf32, #tpu.memory_space<smem>>
    %296 = vector.extract_strided_slice %5 {offsets = [5, 1], sizes = [16, 16], strides = [1, 1]} : vector<22x22xf32> to vector<16x16xf32>
    %297 = vector.broadcast %295 : f32 to vector<16x16xf32>
    %298 = arith.mulf %297, %296 : vector<16x16xf32>
    %299 = arith.addf %291, %298 : vector<16x16xf32>
    %c35_i32_68 = arith.constant 35 : i32
    %300 = arith.addi %6, %c35_i32_68 : i32
    %c2_i32_69 = arith.constant 2 : i32
    %301 = arith.addi %300, %c2_i32_69 : i32
    %302 = arith.index_cast %301 : i32 to index
    %303 = memref.load %arg3[%302] : memref<196xf32, #tpu.memory_space<smem>>
    %304 = vector.extract_strided_slice %5 {offsets = [5, 2], sizes = [16, 16], strides = [1, 1]} : vector<22x22xf32> to vector<16x16xf32>
    %305 = vector.broadcast %303 : f32 to vector<16x16xf32>
    %306 = arith.mulf %305, %304 : vector<16x16xf32>
    %307 = arith.addf %299, %306 : vector<16x16xf32>
    %c35_i32_70 = arith.constant 35 : i32
    %308 = arith.addi %6, %c35_i32_70 : i32
    %c3_i32_71 = arith.constant 3 : i32
    %309 = arith.addi %308, %c3_i32_71 : i32
    %310 = arith.index_cast %309 : i32 to index
    %311 = memref.load %arg3[%310] : memref<196xf32, #tpu.memory_space<smem>>
    %312 = vector.extract_strided_slice %5 {offsets = [5, 3], sizes = [16, 16], strides = [1, 1]} : vector<22x22xf32> to vector<16x16xf32>
    %313 = vector.broadcast %311 : f32 to vector<16x16xf32>
    %314 = arith.mulf %313, %312 : vector<16x16xf32>
    %315 = arith.addf %307, %314 : vector<16x16xf32>
    %c35_i32_72 = arith.constant 35 : i32
    %316 = arith.addi %6, %c35_i32_72 : i32
    %c4_i32_73 = arith.constant 4 : i32
    %317 = arith.addi %316, %c4_i32_73 : i32
    %318 = arith.index_cast %317 : i32 to index
    %319 = memref.load %arg3[%318] : memref<196xf32, #tpu.memory_space<smem>>
    %320 = vector.extract_strided_slice %5 {offsets = [5, 4], sizes = [16, 16], strides = [1, 1]} : vector<22x22xf32> to vector<16x16xf32>
    %321 = vector.broadcast %319 : f32 to vector<16x16xf32>
    %322 = arith.mulf %321, %320 : vector<16x16xf32>
    %323 = arith.addf %315, %322 : vector<16x16xf32>
    %c35_i32_74 = arith.constant 35 : i32
    %324 = arith.addi %6, %c35_i32_74 : i32
    %c5_i32_75 = arith.constant 5 : i32
    %325 = arith.addi %324, %c5_i32_75 : i32
    %326 = arith.index_cast %325 : i32 to index
    %327 = memref.load %arg3[%326] : memref<196xf32, #tpu.memory_space<smem>>
    %328 = vector.extract_strided_slice %5 {offsets = [5, 5], sizes = [16, 16], strides = [1, 1]} : vector<22x22xf32> to vector<16x16xf32>
    %329 = vector.broadcast %327 : f32 to vector<16x16xf32>
    %330 = arith.mulf %329, %328 : vector<16x16xf32>
    %331 = arith.addf %323, %330 : vector<16x16xf32>
    %c35_i32_76 = arith.constant 35 : i32
    %332 = arith.addi %6, %c35_i32_76 : i32
    %c6_i32_77 = arith.constant 6 : i32
    %333 = arith.addi %332, %c6_i32_77 : i32
    %334 = arith.index_cast %333 : i32 to index
    %335 = memref.load %arg3[%334] : memref<196xf32, #tpu.memory_space<smem>>
    %336 = vector.extract_strided_slice %5 {offsets = [5, 6], sizes = [16, 16], strides = [1, 1]} : vector<22x22xf32> to vector<16x16xf32>
    %337 = vector.broadcast %335 : f32 to vector<16x16xf32>
    %338 = arith.mulf %337, %336 : vector<16x16xf32>
    %339 = arith.addf %331, %338 : vector<16x16xf32>
    %c42_i32 = arith.constant 42 : i32
    %340 = arith.addi %6, %c42_i32 : i32
    %c0_i32_78 = arith.constant 0 : i32
    %341 = arith.addi %340, %c0_i32_78 : i32
    %342 = arith.index_cast %341 : i32 to index
    %343 = memref.load %arg3[%342] : memref<196xf32, #tpu.memory_space<smem>>
    %344 = vector.extract_strided_slice %5 {offsets = [6, 0], sizes = [16, 16], strides = [1, 1]} : vector<22x22xf32> to vector<16x16xf32>
    %345 = vector.broadcast %343 : f32 to vector<16x16xf32>
    %346 = arith.mulf %345, %344 : vector<16x16xf32>
    %347 = arith.addf %339, %346 : vector<16x16xf32>
    %c42_i32_79 = arith.constant 42 : i32
    %348 = arith.addi %6, %c42_i32_79 : i32
    %c1_i32_80 = arith.constant 1 : i32
    %349 = arith.addi %348, %c1_i32_80 : i32
    %350 = arith.index_cast %349 : i32 to index
    %351 = memref.load %arg3[%350] : memref<196xf32, #tpu.memory_space<smem>>
    %352 = vector.extract_strided_slice %5 {offsets = [6, 1], sizes = [16, 16], strides = [1, 1]} : vector<22x22xf32> to vector<16x16xf32>
    %353 = vector.broadcast %351 : f32 to vector<16x16xf32>
    %354 = arith.mulf %353, %352 : vector<16x16xf32>
    %355 = arith.addf %347, %354 : vector<16x16xf32>
    %c42_i32_81 = arith.constant 42 : i32
    %356 = arith.addi %6, %c42_i32_81 : i32
    %c2_i32_82 = arith.constant 2 : i32
    %357 = arith.addi %356, %c2_i32_82 : i32
    %358 = arith.index_cast %357 : i32 to index
    %359 = memref.load %arg3[%358] : memref<196xf32, #tpu.memory_space<smem>>
    %360 = vector.extract_strided_slice %5 {offsets = [6, 2], sizes = [16, 16], strides = [1, 1]} : vector<22x22xf32> to vector<16x16xf32>
    %361 = vector.broadcast %359 : f32 to vector<16x16xf32>
    %362 = arith.mulf %361, %360 : vector<16x16xf32>
    %363 = arith.addf %355, %362 : vector<16x16xf32>
    %c42_i32_83 = arith.constant 42 : i32
    %364 = arith.addi %6, %c42_i32_83 : i32
    %c3_i32_84 = arith.constant 3 : i32
    %365 = arith.addi %364, %c3_i32_84 : i32
    %366 = arith.index_cast %365 : i32 to index
    %367 = memref.load %arg3[%366] : memref<196xf32, #tpu.memory_space<smem>>
    %368 = vector.extract_strided_slice %5 {offsets = [6, 3], sizes = [16, 16], strides = [1, 1]} : vector<22x22xf32> to vector<16x16xf32>
    %369 = vector.broadcast %367 : f32 to vector<16x16xf32>
    %370 = arith.mulf %369, %368 : vector<16x16xf32>
    %371 = arith.addf %363, %370 : vector<16x16xf32>
    %c42_i32_85 = arith.constant 42 : i32
    %372 = arith.addi %6, %c42_i32_85 : i32
    %c4_i32_86 = arith.constant 4 : i32
    %373 = arith.addi %372, %c4_i32_86 : i32
    %374 = arith.index_cast %373 : i32 to index
    %375 = memref.load %arg3[%374] : memref<196xf32, #tpu.memory_space<smem>>
    %376 = vector.extract_strided_slice %5 {offsets = [6, 4], sizes = [16, 16], strides = [1, 1]} : vector<22x22xf32> to vector<16x16xf32>
    %377 = vector.broadcast %375 : f32 to vector<16x16xf32>
    %378 = arith.mulf %377, %376 : vector<16x16xf32>
    %379 = arith.addf %371, %378 : vector<16x16xf32>
    %c42_i32_87 = arith.constant 42 : i32
    %380 = arith.addi %6, %c42_i32_87 : i32
    %c5_i32_88 = arith.constant 5 : i32
    %381 = arith.addi %380, %c5_i32_88 : i32
    %382 = arith.index_cast %381 : i32 to index
    %383 = memref.load %arg3[%382] : memref<196xf32, #tpu.memory_space<smem>>
    %384 = vector.extract_strided_slice %5 {offsets = [6, 5], sizes = [16, 16], strides = [1, 1]} : vector<22x22xf32> to vector<16x16xf32>
    %385 = vector.broadcast %383 : f32 to vector<16x16xf32>
    %386 = arith.mulf %385, %384 : vector<16x16xf32>
    %387 = arith.addf %379, %386 : vector<16x16xf32>
    %c42_i32_89 = arith.constant 42 : i32
    %388 = arith.addi %6, %c42_i32_89 : i32
    %c6_i32_90 = arith.constant 6 : i32
    %389 = arith.addi %388, %c6_i32_90 : i32
    %390 = arith.index_cast %389 : i32 to index
    %391 = memref.load %arg3[%390] : memref<196xf32, #tpu.memory_space<smem>>
    %392 = vector.extract_strided_slice %5 {offsets = [6, 6], sizes = [16, 16], strides = [1, 1]} : vector<22x22xf32> to vector<16x16xf32>
    %393 = vector.broadcast %391 : f32 to vector<16x16xf32>
    %394 = arith.mulf %393, %392 : vector<16x16xf32>
    %395 = arith.addf %387, %394 : vector<16x16xf32>
    %396 = arith.index_cast %arg1 : i32 to index
    %397 = memref.load %arg4[%396] : memref<4xf32, #tpu.memory_space<smem>>
    %398 = vector.broadcast %397 : f32 to vector<16x16xf32>
    %399 = arith.addf %395, %398 : vector<16x16xf32>
    %cst_91 = arith.constant 0.000000e+00 : f32
    %400 = vector.broadcast %cst_91 : f32 to vector<18x18xf32>
    %c0_92 = arith.constant 0 : index
    %c0_93 = arith.constant 0 : index
    %401 = vector.load %arg9[%c0_92, %c0_93] : memref<18x18xf32, #tpu.memory_space<vmem>>, vector<18x18xf32>
    tpu.vector_store %arg9[%c0_92, %c0_93], %400 {strides = array<i32>} : memref<18x18xf32, #tpu.memory_space<vmem>>, vector<18x18xf32>,
    %c1 = arith.constant 1 : index
    %c1_94 = arith.constant 1 : index
    %402 = vector.load %arg9[%c1, %c1_94] : memref<18x18xf32, #tpu.memory_space<vmem>>, vector<16x16xf32>
    tpu.vector_store %arg9[%c1, %c1_94], %399 {strides = array<i32>} : memref<18x18xf32, #tpu.memory_space<vmem>>, vector<16x16xf32>,
    %c0_95 = arith.constant 0 : index
    %c0_96 = arith.constant 0 : index
    %403 = vector.load %arg9[%c0_95, %c0_96] : memref<18x18xf32, #tpu.memory_space<vmem>>, vector<18x18xf32>
    %c9_i32 = arith.constant 9 : i32
    %404 = arith.muli %arg1, %c9_i32 : i32
    %405 = arith.index_cast %404 : i32 to index
    %406 = memref.load %arg5[%405] : memref<36xf32, #tpu.memory_space<smem>>
    %407 = vector.extract_strided_slice %403 {offsets = [0, 0], sizes = [16, 16], strides = [1, 1]} : vector<18x18xf32> to vector<16x16xf32>
    %408 = vector.broadcast %406 : f32 to vector<16x16xf32>
    %409 = arith.mulf %408, %407 : vector<16x16xf32>
    %c0_i32_97 = arith.constant 0 : i32
    %410 = arith.addi %404, %c0_i32_97 : i32
    %c1_i32_98 = arith.constant 1 : i32
    %411 = arith.addi %410, %c1_i32_98 : i32
    %412 = arith.index_cast %411 : i32 to index
    %413 = memref.load %arg5[%412] : memref<36xf32, #tpu.memory_space<smem>>
    %414 = vector.extract_strided_slice %403 {offsets = [0, 1], sizes = [16, 16], strides = [1, 1]} : vector<18x18xf32> to vector<16x16xf32>
    %415 = vector.broadcast %413 : f32 to vector<16x16xf32>
    %416 = arith.mulf %415, %414 : vector<16x16xf32>
    %417 = arith.addf %409, %416 : vector<16x16xf32>
    %c0_i32_99 = arith.constant 0 : i32
    %418 = arith.addi %404, %c0_i32_99 : i32
    %c2_i32_100 = arith.constant 2 : i32
    %419 = arith.addi %418, %c2_i32_100 : i32
    %420 = arith.index_cast %419 : i32 to index
    %421 = memref.load %arg5[%420] : memref<36xf32, #tpu.memory_space<smem>>
    %422 = vector.extract_strided_slice %403 {offsets = [0, 2], sizes = [16, 16], strides = [1, 1]} : vector<18x18xf32> to vector<16x16xf32>
    %423 = vector.broadcast %421 : f32 to vector<16x16xf32>
    %424 = arith.mulf %423, %422 : vector<16x16xf32>
    %425 = arith.addf %417, %424 : vector<16x16xf32>
    %c3_i32_101 = arith.constant 3 : i32
    %426 = arith.addi %404, %c3_i32_101 : i32
    %c0_i32_102 = arith.constant 0 : i32
    %427 = arith.addi %426, %c0_i32_102 : i32
    %428 = arith.index_cast %427 : i32 to index
    %429 = memref.load %arg5[%428] : memref<36xf32, #tpu.memory_space<smem>>
    %430 = vector.extract_strided_slice %403 {offsets = [1, 0], sizes = [16, 16], strides = [1, 1]} : vector<18x18xf32> to vector<16x16xf32>
    %431 = vector.broadcast %429 : f32 to vector<16x16xf32>
    %432 = arith.mulf %431, %430 : vector<16x16xf32>
    %433 = arith.addf %425, %432 : vector<16x16xf32>
    %c3_i32_103 = arith.constant 3 : i32
    %434 = arith.addi %404, %c3_i32_103 : i32
    %c1_i32_104 = arith.constant 1 : i32
    %435 = arith.addi %434, %c1_i32_104 : i32
    %436 = arith.index_cast %435 : i32 to index
    %437 = memref.load %arg5[%436] : memref<36xf32, #tpu.memory_space<smem>>
    %438 = vector.extract_strided_slice %403 {offsets = [1, 1], sizes = [16, 16], strides = [1, 1]} : vector<18x18xf32> to vector<16x16xf32>
    %439 = vector.broadcast %437 : f32 to vector<16x16xf32>
    %440 = arith.mulf %439, %438 : vector<16x16xf32>
    %441 = arith.addf %433, %440 : vector<16x16xf32>
    %c3_i32_105 = arith.constant 3 : i32
    %442 = arith.addi %404, %c3_i32_105 : i32
    %c2_i32_106 = arith.constant 2 : i32
    %443 = arith.addi %442, %c2_i32_106 : i32
    %444 = arith.index_cast %443 : i32 to index
    %445 = memref.load %arg5[%444] : memref<36xf32, #tpu.memory_space<smem>>
    %446 = vector.extract_strided_slice %403 {offsets = [1, 2], sizes = [16, 16], strides = [1, 1]} : vector<18x18xf32> to vector<16x16xf32>
    %447 = vector.broadcast %445 : f32 to vector<16x16xf32>
    %448 = arith.mulf %447, %446 : vector<16x16xf32>
    %449 = arith.addf %441, %448 : vector<16x16xf32>
    %c6_i32_107 = arith.constant 6 : i32
    %450 = arith.addi %404, %c6_i32_107 : i32
    %c0_i32_108 = arith.constant 0 : i32
    %451 = arith.addi %450, %c0_i32_108 : i32
    %452 = arith.index_cast %451 : i32 to index
    %453 = memref.load %arg5[%452] : memref<36xf32, #tpu.memory_space<smem>>
    %454 = vector.extract_strided_slice %403 {offsets = [2, 0], sizes = [16, 16], strides = [1, 1]} : vector<18x18xf32> to vector<16x16xf32>
    %455 = vector.broadcast %453 : f32 to vector<16x16xf32>
    %456 = arith.mulf %455, %454 : vector<16x16xf32>
    %457 = arith.addf %449, %456 : vector<16x16xf32>
    %c6_i32_109 = arith.constant 6 : i32
    %458 = arith.addi %404, %c6_i32_109 : i32
    %c1_i32_110 = arith.constant 1 : i32
    %459 = arith.addi %458, %c1_i32_110 : i32
    %460 = arith.index_cast %459 : i32 to index
    %461 = memref.load %arg5[%460] : memref<36xf32, #tpu.memory_space<smem>>
    %462 = vector.extract_strided_slice %403 {offsets = [2, 1], sizes = [16, 16], strides = [1, 1]} : vector<18x18xf32> to vector<16x16xf32>
    %463 = vector.broadcast %461 : f32 to vector<16x16xf32>
    %464 = arith.mulf %463, %462 : vector<16x16xf32>
    %465 = arith.addf %457, %464 : vector<16x16xf32>
    %c6_i32_111 = arith.constant 6 : i32
    %466 = arith.addi %404, %c6_i32_111 : i32
    %c2_i32_112 = arith.constant 2 : i32
    %467 = arith.addi %466, %c2_i32_112 : i32
    %468 = arith.index_cast %467 : i32 to index
    %469 = memref.load %arg5[%468] : memref<36xf32, #tpu.memory_space<smem>>
    %470 = vector.extract_strided_slice %403 {offsets = [2, 2], sizes = [16, 16], strides = [1, 1]} : vector<18x18xf32> to vector<16x16xf32>
    %471 = vector.broadcast %469 : f32 to vector<16x16xf32>
    %472 = arith.mulf %471, %470 : vector<16x16xf32>
    %473 = arith.addf %465, %472 : vector<16x16xf32>
    %474 = arith.index_cast %arg1 : i32 to index
    %475 = memref.load %arg6[%474] : memref<4xf32, #tpu.memory_space<smem>>
    %476 = vector.broadcast %475 : f32 to vector<16x16xf32>
    %477 = arith.addf %473, %476 : vector<16x16xf32>
    %cst_113 = arith.constant 0.000000e+00 : f32
    %478 = vector.broadcast %cst_113 : f32 to vector<16x16xf32>
    %479 = arith.maximumf %477, %478 : vector<16x16xf32>
    %c0_114 = arith.constant 0 : index
    %c0_115 = arith.constant 0 : index
    %c0_116 = arith.constant 0 : index
    %c0_117 = arith.constant 0 : index
    %480 = vector.load %arg7[%c0_114, %c0_115, %c0_116, %c0_117] : memref<1x1x16x16xf32, #tpu.memory_space<vmem>>, vector<1x1x16x16xf32>
    %481 = vector.shape_cast %480 : vector<1x1x16x16xf32> to vector<16x16xf32>
    %482 = vector.shape_cast %479 : vector<16x16xf32> to vector<1x1x16x16xf32>
    tpu.vector_store %arg7[%c0_114, %c0_115, %c0_116, %c0_117], %482 {strides = array<i32>} : memref<1x1x16x16xf32, #tpu.memory_space<vmem>>, vector<1x1x16x16xf32>,
    return
  }
  func.func @transform_0(%arg0: i32, %arg1: i32) -> (i32, i32, i32, i32) {
    %c0_i32 = arith.constant 0 : i32
    %c0_i32_0 = arith.constant 0 : i32
    %c0_i32_1 = arith.constant 0 : i32
    return %arg0, %arg1, %c0_i32, %c0_i32_0 : i32, i32, i32, i32
  }
  func.func @transform_1(%arg0: i32, %arg1: i32) -> i32 {
    %c0_i32 = arith.constant 0 : i32
    %c0_i32_0 = arith.constant 0 : i32
    return %c0_i32 : i32
  }
  func.func @transform_2(%arg0: i32, %arg1: i32) -> i32 {
    %c0_i32 = arith.constant 0 : i32
    %c0_i32_0 = arith.constant 0 : i32
    return %c0_i32 : i32
  }
  func.func @transform_3(%arg0: i32, %arg1: i32) -> i32 {
    %c0_i32 = arith.constant 0 : i32
    %c0_i32_0 = arith.constant 0 : i32
    return %c0_i32 : i32
  }
  func.func @transform_4(%arg0: i32, %arg1: i32) -> i32 {
    %c0_i32 = arith.constant 0 : i32
    %c0_i32_0 = arith.constant 0 : i32
    return %c0_i32 : i32
  }
  func.func @transform_5(%arg0: i32, %arg1: i32) -> (i32, i32, i32, i32) {
    %c0_i32 = arith.constant 0 : i32
    %c0_i32_0 = arith.constant 0 : i32
    %c0_i32_1 = arith.constant 0 : i32
    return %arg0, %arg1, %c0_i32, %c0_i32_0 : i32, i32, i32, i32
  }
}

</mosaic_0001>

<bundles_post_ra>
// kernel: tpu_custom_call.1
= control target key start
LH: loop header
LB: loop body
LE: loop exit
PB: predicated region body
PF: predicated region fallthrough
CT: control target
= control target key end

     0   :  { %s2920_s0 = inlined_call_operand.hbm [shape: f32[2,4,16,16], index: 0, kind: input, shape index: {}]   ;;  %s2921_s1 = inlined_call_operand.vmem [shape: f32[196], index: 1, kind: input, shape index: {}]   ;;  %s2922_s2 = inlined_call_operand.vmem [shape: f32[4], index: 2, kind: input, shape index: {}]   ;;  %s2923_s3 = inlined_call_operand.vmem [shape: f32[36], index: 3, kind: input, shape index: {}]   ;;  %s2924_s4 = inlined_call_operand.vmem [shape: f32[4], index: 4, kind: input, shape index: {}]   ;;  %s2925_s5 = inlined_call_operand.hbm [shape: f32[2,4,16,16], index: 5, kind: output, shape index: {}]  }
   0x1   :  { %2933 = sst [smem:[#allocation23_spill]] %s2921_s1 }
   0x2   :  { %2934 = sst [smem:[#allocation24_spill]] %s2922_s2 }
   0x3   :  { %2935 = sst [smem:[#allocation25_spill]] %s2923_s3 }
   0x4   :  { %2936 = sst [smem:[#allocation26_spill]] %s2924_s4 }
   0x5   :  { %10 = vsyncpa [#allocation5], 0 }
   0x6   :  { %12 = vsyncpa [#allocation5 + $0x1], 0 }
   0x7   :  { %13 = vsyncpa [#allocation7], 0 }
   0x8   :  { %14 = vsyncpa [#allocation10], 0 }
   0x9   :  { %15 = vsyncpa [#allocation13], 0 }
   0xa   :  { %16 = vsyncpa [#allocation6], 0 }
   0xb   :  { %18 = vsyncpa [#allocation6 + $0x1], 0  ;;  %s2084_s18 = smov 0   ;;  %s2086_s19 = smov 0  }
   0xc   :  { %s2088_s20 = smov 0   ;;  %s2090_s21 = smov 0  }
   0xd   :  { %s2092_s22 = smov 0   ;;  %s2094_s23 = smov 0  }
   0xe   :  { %s2096_s24 = smov 0   ;;  %s2098_s25 = smov 0  }
   0xf LB: > { %2937 = sst [smem:[#allocation20_spill]] %s2005_s18  ;;  %s1673_s26 = sadd.s32 4294967295, %s2033_s25   ;;  %s2033_s25 = sphi %s2098_s25, %s24_s25   ;;  %s2029_s24 = sphi %s2096_s24, %s2967_s24   ;;  %s2025_s23 = sphi %s2094_s23, %s2966_s23   ;;  %s2021_s22 = sphi %s2092_s22, %s2965_s22   ;;  %s2017_s21 = sphi %s2090_s21, %s2964_s21   ;;  %s2013_s20 = sphi %s2088_s20, %s2963_s20   ;;  %s2009_s19 = sphi %s2086_s19, %s2962_s19   ;;  %s2005_s18 = sphi %s2084_s18, %s2961_s18  }
  0x10   : > { %s1674_s27 = sadd.s32 4294967294, %s2033_s25   ;;  %p58_p0 = scmp.ne.s32.totalorder %s2009_s19, %s2005_s18 }
  0x11   : > { %p2128_p1 = scmp.eq.s32.totalorder %s1673_s26, 0  ;;  %p2132_p2 = scmp.eq.s32.totalorder %s1673_s26, 7 }
  0x12   : > { %p174_p3 = scmp.eq.s32.totalorder %s1674_s27, 7  ;;  %p1675_p5 = scmp.ge.s32.totalorder %s2033_s25, 1 }
  0x13   : > { %s2938_s28 = scalar_select %p2128_p1, 1, 0 }
  0x14   : > { %s2939_s29 = scalar_select %p2132_p2, 1, 0 }
  0x15   : > { %p2138_p4 = por %p2128_p1, %p58_p0  ;;  %p2143_p6 = por %p174_p3, %p58_p0 }
  0x16   : > { %p181_p7 = scmp.lt.s32.totalorder %s2033_s25, 9  ;;  %s2943_s2 = sld [smem:[#allocation24_spill]] }
  0x17   : > { %s2940_s30 = scalar_select %p2138_p4, 1, 0 }
  0x18   : > { %s2941_s6 = scalar_select %p2143_p6, 1, 0 }
  0x19   : > { %p2151_p8 = pnand %p1675_p5, %p181_p7  ;;  %s2946_s1 = sld [smem:[#allocation23_spill]] }
  0x1a   : > { %2942 = sst [smem:[#allocation21_spill]] %s2941_s6 }
  0x1b   : > { %s2944_s10 = scalar_select %p2151_p8, 1, 0 }
  0x1c   : > { %s205_s9 = sshll.u32 %s2943_s2, 4  ;;  %p1718_p9 = pneg %p2151_p8  ;;  %s206_s9 = int_to_ptr.vmem [resolvable:$true] %s205_s9 }
  0x1d   : > { %s1833_s15 = scalar_lea.vmem %s206_s9, 16  ;;  %p1841_p3 = scmp.lt.s32.totalorder %s206_s9, %s206_s9 }
  0x1e   : > { %p2159_p10 = pnand %p1718_p9, %p2128_p1  ;;  %p1834_p11 = scmp.ne.s32.totalorder %s206_s9, %s1833_s15 }
  0x1f   : > { %s194_s14 = sshll.u32 %s2946_s1, 4  ;;  %p1842_p5 = scmp.lt.s32.totalorder %s1833_s15, %s1833_s15  ;;  %s195_s14 = int_to_ptr.vmem [resolvable:$true] %s194_s14 }
  0x20   : > { %p1835_p12 = pneg %p2159_p10 }
  0x21   : > { %p1843_p7 = por %p1842_p5, %p1841_p3 }
  0x22   : > { %p1836_p13 = pnand %p1835_p12, %p1834_p11 }
  0x24   : > { %p1837_p0 = pneg %p1836_p13 }
  0x26   : > { %p1844_p9 = pnand %p1843_p7, %p1837_p0 }
  0x28   : > { %1847 = shalt.err (!%p1844_p9)
}
  0x29   : > { %s2035_s16 = smov [#allocation9]   ;;  %s1848_s17 = scalar_lea.vmem %s195_s14, 32 }
  0x2a   : > { %1724 = dma.vmem_to_smem (!%p2159_p10), %s206_s9, 16, %s2035_s16, [#allocation10]  }
  0x2b   : > { %p1849_p6 = scmp.ne.s32.totalorder %s195_s14, %s1848_s17  ;;  %p1856_p8 = scmp.lt.s32.totalorder %s195_s14, %s195_s14 }
  0x2c   : > { %p1857_p2 = scmp.lt.s32.totalorder %s1848_s17, %s1848_s17 }
  0x2d   : > { %p1851_p1 = pnand %p1849_p6, %p1835_p12 }
  0x2e   : > { %p1858_p11 = por %p1857_p2, %p1856_p8 }
  0x2f   : > { %p1852_p4 = pneg %p1851_p1 }
  0x31   : > { %p1859_p13 = pnand %p1858_p11, %p1852_p4 }
  0x33   : > { %1862 = shalt.err (!%p1859_p13)
}
  0x34   : > { %s2036_s26 = smov [#allocation8]   ;;  %s2947_s3 = sld [smem:[#allocation25_spill]] }
  0x35   : > { %1721 = dma.vmem_to_smem (!%p2159_p10), %s195_s14, 32, %s2036_s26, [#allocation7]  }
  0x36   : > { %s2948_s4 = sld [smem:[#allocation26_spill]] }
  0x3a   : > { %s216_s8 = sshll.u32 %s2947_s3, 4  ;;  %s217_s8 = int_to_ptr.vmem [resolvable:$true] %s216_s8 }
  0x3b   : > { %s1863_s15 = scalar_lea.vmem %s217_s8, 16  ;;  %p1871_p6 = scmp.lt.s32.totalorder %s217_s8, %s217_s8 }
  0x3c   : > { %s227_s13 = sshll.u32 %s2948_s4, 4  ;;  %p1864_p1 = scmp.ne.s32.totalorder %s217_s8, %s1863_s15  ;;  %s228_s13 = int_to_ptr.vmem [resolvable:$true] %s227_s13 }
  0x3d   : > { %p1872_p8 = scmp.lt.s32.totalorder %s1863_s15, %s1863_s15 }
  0x3e   : > { %p1866_p2 = pnand %p1864_p1, %p1835_p12 }
  0x3f   : > { %p1873_p0 = por %p1872_p8, %p1871_p6 }
  0x40   : > { %p1867_p4 = pneg %p1866_p2 }
  0x42   : > { %p1874_p3 = pnand %p1873_p0, %p1867_p4 }
  0x44   : > { %1877 = shalt.err (!%p1874_p3)
}
  0x45   : > { %s2037_s14 = smov [#allocation11]   ;;  %s1878_s16 = scalar_lea.vmem %s228_s13, 16 }
  0x46   : > { %1727 = dma.vmem_to_smem (!%p2159_p10), %s217_s8, 16, %s2037_s14, [#allocation10]  }
  0x47   : > { %p1879_p5 = scmp.ne.s32.totalorder %s228_s13, %s1878_s16  ;;  %p1886_p11 = scmp.lt.s32.totalorder %s228_s13, %s228_s13 }
  0x48   : > { %p1887_p13 = scmp.lt.s32.totalorder %s1878_s16, %s1878_s16 }
  0x49   : > { %p1881_p7 = pnand %p1879_p5, %p1835_p12 }
  0x4a   : > { %p1888_p1 = por %p1887_p13, %p1886_p11 }
  0x4b   : > { %p1882_p9 = pneg %p1881_p7 }
  0x4d   : > { %p1889_p2 = pnand %p1888_p1, %p1882_p9 }
  0x4f   : > { %1892 = shalt.err (!%p1889_p2)
}
  0x50   : > { %s2038_s17 = smov [#allocation12]   ;;  %s33_s26 = sadd.s32 1, %s2025_s23 }
  0x51   : > { %1730 = dma.vmem_to_smem (!%p2159_p10), %s228_s13, 16, %s2038_s17, [#allocation13]  }
  0x52   : > { %s36_s27 = sadd.s32 1, %s2029_s24  ;;  %p34_p12 = scmp.ge.s32.totalorder %s33_s26, 4 }
  0x53   : > { %s45_s7 = sadd.s32 1, %s2013_s20  ;;  %p52_p4 = scmp.ne.s32.totalorder %s2013_s20, %s2009_s19 }
  0x54   : > { %p53_p6 = scmp.eq.s32.totalorder %s2033_s25, 0  ;;  %s2969_s26 = smov (%p34_p12, %s33_s26), 0 }
  0x55   : > { %2949 = sst [smem:[#allocation22_spill]] %s2969_s26  ;;  %s2971_s27 = smov (!%p34_p12, %s36_s27), %s2029_s24 }
  0x56   : > { %s41_s11 = ssub.s32 %s2025_s23, %s2969_s26  ;;  %p2205_p8 = por %p53_p6, %p52_p4 }
  0x57   : > { %p38_p10 = scmp.ge.s32.totalorder %s2971_s27, 2  ;;  %p2951_p0 = scmp.ne.s32.totalorder %s2939_s29, 0 }
  0x58   : > { %p1743_p5 = scmp.lt.s32.totalorder %s2033_s25, 8  ;;  %s238_s12 = sand.u32 1, %s2013_s20  }
  0x59   : > { %p2211_p3 = por %p2951_p0, %p52_p4  ;;  %s2973_s27 = smov (%p38_p10, %s2971_s27), 0 }
  0x5a   : > { %s1681_s13 = sshll.u32 %s238_s12, 4  ;;  %s40_s15 = ssub.s32 %s2029_s24, %s2973_s27 }
  0x5b   : > { %s42_s14 = sor.u32 %s41_s11, %s40_s15  ;;  %s1682_s16 = sshll.u32 %s2025_s23, 1 }
  0x5c   : > { %p43_p7 = scmp.eq.s32.totalorder %s42_s14, 0  ;;  %s1683_s17 = sshll.u32 %s2029_s24, 3 }
  0x5d   : > { %s248_s1 = sadd.s32 %s1683_s17, %s1682_s16  ;;  %s242_s2 = scalar_lea.vmem [#allocation4], %s1681_s13 }
  0x5e   : > { %s251_s29 = sshll.u32 %s242_s2, 4  ;;  %s1684_s4 = sshll.u32 %s248_s1, 7  ;;  %s2226_s29 = int_to_ptr.vmem [resolvable:$true] %s251_s29 }
  0x5f   : > { %s2224_s3 = scalar_select %p43_p7, %s2013_s20, %s45_s7  }
  0x60   : > { %s2231_s18 = scalar_lea.hbm %s2920_s0, %s1684_s4  ;;  %p2237_p9 = pnand %p1743_p5, %p2205_p8 }
  0x61   : > { %s2241_s1 = scalar_lea.sflag [#allocation5], %s238_s12  ;;  %s1893_s2 = scalar_lea.hbm %s2231_s18, 256 }
  0x62   : > { %p1894_p11 = scmp.ne.s32.totalorder %s2231_s18, %s1893_s2  ;;  %p1895_p13 = pneg %p2237_p9 }
  0x63   : > { %s1898_s26 = scalar_lea.hbm %s2920_s0, 2048  ;;  %p1899_p12 = scmp.lt.u32.totalorder %s2231_s18, %s2920_s0 }
  0x64   : > { %p1896_p1 = pnand %p1895_p13, %p1894_p11  ;;  %p1900_p4 = scmp.lt.u32.totalorder %s1898_s26, %s1893_s2 }
  0x65   : > { %p1902_p8 = scmp.lt.u32.totalorder %s1893_s2, %s2231_s18 }
  0x66   : > { %p1897_p2 = pneg %p1896_p1  ;;  %p1901_p6 = por %p1900_p4, %p1899_p12 }
  0x68   : > { %p1903_p10 = por %p1902_p8, %p1901_p6 }
  0x6a   : > { %p1904_p0 = pnand %p1903_p10, %p1897_p2 }
  0x6c   : > { %1907 = shalt.err (!%p1904_p0)
}
  0x6d   : > { %s1908_s12 = scalar_lea.vmem %s2226_s29, 256  ;;  %s2039_s13 = smov [#allocation4]  }
  0x6e   : > { %p1909_p5 = scmp.ne.s32.totalorder %s2226_s29, %s1908_s12  ;;  %s1913_s15 = sshll.u32 %s2039_s13, 4  ;;  %s1914_s15 = int_to_ptr.vmem [resolvable:$false] %s1913_s15 }
  0x6f   : > { %s1915_s14 = scalar_lea.vmem %s1914_s15, 512  ;;  %p1916_p1 = scmp.lt.s32.totalorder %s2226_s29, %s1914_s15 }
  0x70   : > { %p1911_p7 = pnand %p1909_p5, %p1895_p13  ;;  %p1917_p12 = scmp.lt.s32.totalorder %s1915_s14, %s1908_s12 }
  0x72   : > { %p1912_p11 = pneg %p1911_p7  ;;  %p1918_p4 = por %p1917_p12, %p1916_p1 }
  0x74   : > { %p1919_p6 = pnand %p1918_p4, %p1912_p11 }
  0x76   : > { %1922 = shalt.err (!%p1919_p6)
}
  0x77   : > { %s2040_s16 = smov 128   ;;  %s2041_s17 = smov 8  }
  0x78   : > { %1734 = dma.hbm_to_vmem [thread:$0]  (!%p2237_p9), %s2231_s18, 256, %s2226_s29, %s2241_s1, %s2040_s16, %s2040_s16, %s2041_s17  }
  0x79   : > { %p2954_p13 = scmp.ne.s32.totalorder %s2944_s10, 0 }
  0x7a   : > { %s2272_s2 = sand.u32 (!%p2954_p13), 1, %s2009_s19   ;;  %p2955_p2 = scmp.ne.s32.totalorder (!%p2954_p13), %s2940_s30, 0 }
  0x7b   : > { %263 = sbr.rel (%p2954_p13) target bundleno = 834 (0x342), region = 40  ;;  %s1686_s4 = sshll.u32 (!%p2954_p13), %s2272_s2, 4 }
  0x7c   : > { %s266_s6 = scalar_lea.sflag (!%p2954_p13), [#allocation5], %s2272_s2  ;;  %s269_s26 = scalar_lea.vmem (!%p2954_p13), [#allocation4], %s1686_s4 }
  0x82   : > { %1984 = dma.done.wait (%p2955_p2), %s266_s6, 256  }
  0x83   : > { %1986 = vsyncadd (%p2955_p2), %s266_s6, 4294967040  ;;  %p2956_p9 = scmp.ne.s32.totalorder %s2938_s28, 0 }
  0x85   : > { %1988 = dma.done.wait (%p2956_p9), [#allocation7], 32  }
  0x86   : > { %1990 = vsyncadd (%p2956_p9), [#allocation7], 4294967264 }
  0x87   : > { %1992 = dma.done.wait (%p2956_p9), [#allocation10], 32  }
  0x88   : > { %1994 = vsyncadd (%p2956_p9), [#allocation10], 4294967264 }
  0x89   : > { %1996 = dma.done.wait (%p2956_p9), [#allocation13], 16  }
  0x8a   : > { %1998 = vsyncadd (%p2956_p9), [#allocation13], 4294967280 }
  0x8b   : > { %290 = sfence }
  0x8c   : > { %v318_v0 = vld [vmem:[%s269_s26] sm:$0xff]  ;;  %vm313_vm0 = vcmask 179200   ;;  %s2042_s18 = smov 3   ;;  %v2043_v1 = vmov 0.0   ;;  %vm316_vm1 = vcmask 177152   ;;  %v319_v2 = vld [vmem:[%s269_s26 + $0x8] sm:$0xff] }
  0x8d   : > { %322 = vrot.lane.b32.xlu0 %v318_v0, %s2042_s18  ;;  %314 = vst.msk [vmem:[#allocation2] sm:$0xff] %vm313_vm0, %v2043_v1  ;;  %315 = vst.msk [vmem:[#allocation2 + $0x8] sm:$0xff] %vm313_vm0, %v2043_v1  ;;  %s2298_s30 = smul.u32 49, %s2017_s21  ;;  %vm328_vm2 = vcmask 154648   ;;  %s2044_s16 = smov 126   ;;  %vm438_vm3 = vcmask 1046528  }
  0x8e   : > { %317 = vst.msk [vmem:[#allocation2 + $0x10] sm:$0x3f] %vm316_vm1, %v2043_v1  ;;  %s2045_s17 = smov 127   ;;  %vm589_vm4 = vcmask 1045504   ;;  %vm740_vm5 = vcmask 1044480   ;;  %vm891_vm6 = vcmask 1043456  }
  0x8f   : > { %s354_s28 = sadd.s32 2, %s2298_s30  ;;  %s339_s10 = sadd.s32 1, %s2298_s30  ;;  %vm1042_vm7 = vcmask 1042432   ;;  %vm1193_vm8 = vcmask 1041408   ;;  %vm1339_vm9 = vcmask 146432   ;;  %vm1342_vm10 = vcmask 140288  }
  0x90   : > { %s2302_s29 = sld [smem:[#allocation8 + %s354_s28]]  ;;  %s369_s1 = sadd.s32 3, %s2298_s30  ;;  %1340 = vst.msk [vmem:[#allocation3] sm:$0xff] %vm1339_vm9, %v2043_v1  ;;  %1341 = vst.msk [vmem:[#allocation3 + $0x8] sm:$0xff] %vm1339_vm9, %v2043_v1  ;;  %vm1352_vm11 = vcmask 138248   ;;  %vm1523_vm12 = vcmask 130048  }
  0x91   : > { %324 = vrot.lane.b32.xlu0 %v319_v2, %s2042_s18  ;;  %s340_s11 = sld [smem:[#allocation8 + %s339_s10]]  ;;  %s384_s8 = sadd.s32 4, %s2298_s30  ;;  %1343 = vst.msk [vmem:[#allocation3 + $0x10] sm:$0x3] %vm1342_vm10, %v2043_v1 }
  0x92   : > { %s2305_s7 = sld [smem:[#allocation8 + %s369_s1]]  ;;  %s399_s13 = sadd.s32 5, %s2298_s30 }
  0x93   : > { %s2309_s12 = sld [smem:[#allocation8 + %s384_s8]]  ;;  %s448_s14 = sadd.s32 8, %s2298_s30 }
  0x94   : > { %s2317_s15 = sld [smem:[#allocation8 + %s399_s13]]  ;;  %s414_s6 = sadd.s32 6, %s2298_s30 }
  0x95   : > { %s449_s26 = sld [smem:[#allocation8 + %s448_s14]]  ;;  %s470_s28 = sadd.s32 9, %s2298_s30 }
  0x96   : > { %v356_v5 = vstv %s2302_s29  ;;  %s2328_s18 = sld [smem:[#allocation8 + %s414_s6]]  ;;  %s2046_s10 = smov 125  }
  0x97   : > { %v341_v6 = vstv %s340_s11  ;;  %s471_s29 = sld [smem:[#allocation8 + %s470_s28]]  ;;  %s492_s11 = sadd.s32 10, %s2298_s30 }
  0x98   : > { %v371_v10 = vstv %s2305_s7  ;;  %s2047_s1 = smov 124   ;;  %s493_s7 = sld [smem:[#allocation8 + %s492_s11]] }
  0x99   : > { %v386_v14 = vstv %s2309_s12  ;;  %s514_s8 = sadd.s32 11, %s2298_s30  ;;  %s2048_s12 = smov 123  }
  0x9a   : > { %v401_v17 = vstv %s2317_s15  ;;  %s515_s13 = sld [smem:[#allocation8 + %s514_s8]]  ;;  %s536_s15 = sadd.s32 12, %s2298_s30 }
  0x9b   : > { %v450_v20 = vstv %s449_s26  ;;  %s2049_s14 = smov 122   ;;  %s537_s6 = sld [smem:[#allocation8 + %s536_s15]] }
  0x9c   : > { %v416_v21 = vstv %s2328_s18  ;;  %s558_s26 = sadd.s32 13, %s2298_s30  ;;  %s599_s28 = sadd.s32 15, %s2298_s30 }
  0x9d   : > { %v472_v26 = vstv %s471_s29  ;;  %s559_s18 = sld [smem:[#allocation8 + %s558_s26]]  ;;  %s621_s11 = sadd.s32 16, %s2298_s30 }
  0x9e   : > { %v494_v33 = vstv %s493_s7  ;;  %s600_s29 = sld [smem:[#allocation8 + %s599_s28]]  ;;  %s643_s8 = sadd.s32 17, %s2298_s30 }
  0x9f   : > { %s622_s7 = sld [smem:[#allocation8 + %s621_s11]]  ;;  %s665_s15 = sadd.s32 18, %s2298_s30 }
  0xa0   : > { %v516_v40 = vstv %s515_s13  ;;  %s644_s13 = sld [smem:[#allocation8 + %s643_s8]]  ;;  %s687_s26 = sadd.s32 19, %s2298_s30 }
  0xa1   : > { %v538_v49 = vstv %s537_s6  ;;  %s666_s6 = sld [smem:[#allocation8 + %s665_s15]]  ;;  %s709_s28 = sadd.s32 20, %s2298_s30 }
  0xa2   : > { %s750_s11 = sadd.s32 22, %s2298_s30  ;;  %s772_s8 = sadd.s32 23, %s2298_s30 }
  0xa3   : > { %v560_v60 = vstv %s559_s18  ;;  %s688_s18 = sld [smem:[#allocation8 + %s687_s26]]  ;;  %s794_s15 = sadd.s32 24, %s2298_s30 }
  0xa4   : > { %s816_s26 = sadd.s32 25, %s2298_s30 }
  0xff   : > { %v323_v3 = vpop.permute.xlu0 %322 }
 0x100   : > { %329 = vst.msk [vmem:[#allocation2 + $0x3] sm:$0xff] %vm328_vm2, %v323_v3 }
 0x103   : > { %v325_v4 = vpop.permute.xlu0 %324 }
 0x104   : > { %330 = vst.msk [vmem:[#allocation2 + $0xb] sm:$0xff] %vm328_vm2, %v325_v4  ;;  %v601_v4 = vstv %s600_s29  ;;  %s710_s29 = sld [smem:[#allocation8 + %s709_s28]]  ;;  %s838_s28 = sadd.s32 26, %s2298_s30 }
 0x107   : > { %v2312_v7 = vld [vmem:[#allocation2] sm:$0xff] }
 0x108   : > { %v357_v8 = vmul.f32 %v356_v5, %v2312_v7  ;;  %v342_v9 = vmul.f32 %v341_v6, %v2312_v7  ;;  %v372_v13 = vmul.f32 %v371_v10, %v2312_v7  ;;  %v387_v15 = vmul.f32 %v386_v14, %v2312_v7 }
 0x109   : > { %v402_v18 = vmul.f32 %v401_v17, %v2312_v7  ;;  %v451_v23 = vmul.f32 %v450_v20, %v2312_v7  ;;  %v417_v24 = vmul.f32 %v416_v21, %v2312_v7  ;;  %v473_v31 = vmul.f32 %v472_v26, %v2312_v7 }
 0x10a   : > { %361 = vrot.lane.b32.xlu0 %v357_v8, %s2044_s16  ;;  %346 = vrot.lane.b32.xlu1 %v342_v9, %s2045_s17  ;;  %v495_v39 = vmul.f32 %v494_v33, %v2312_v7  ;;  %v517_v47 = vmul.f32 %v516_v40, %v2312_v7  ;;  %v539_v57 = vmul.f32 %v538_v49, %v2312_v7 }
 0x10b   : > { %v2323_v11 = vld [vmem:[#allocation2 + $0x8] sm:$0xff]  ;;  %v2351_v29 = vld [vmem:[#allocation2 + $0x10] sm:$0x3f]  ;;  %v457_v30 = vrot.slane %v451_v23, 1  ;;  %v479_v38 = vrot.slane %v473_v31, 1  ;;  %v561_v3 = vmul.f32 %v560_v60, %v2312_v7 }
 0x10c   : > { %v343_v12 = vmul.f32 %v341_v6, %v2323_v11  ;;  %v358_v16 = vmul.f32 %v356_v5, %v2323_v11  ;;  %v373_v19 = vmul.f32 %v371_v10, %v2323_v11  ;;  %v452_v22 = vmul.f32 %v450_v20, %v2323_v11 }
 0x10d   : > { %v388_v25 = vmul.f32 %v386_v14, %v2323_v11  ;;  %v474_v28 = vmul.f32 %v472_v26, %v2323_v11  ;;  %v403_v32 = vmul.f32 %v401_v17, %v2323_v11  ;;  %v496_v36 = vmul.f32 %v494_v33, %v2323_v11 }
 0x10e   : > { %376 = vrot.lane.b32.xlu0 %v372_v13, %s2046_s10  ;;  %348 = vrot.lane.b32.xlu1 %v343_v12, %s2045_s17  ;;  %v458_v27 = vrot.slane %v452_v22, 1  ;;  %v453_v37 = vmul.f32 %v450_v20, %v2351_v29  ;;  %v418_v41 = vmul.f32 %v416_v21, %v2323_v11  ;;  %v518_v42 = vmul.f32 %v516_v40, %v2323_v11 }
 0x10f   : > { %v480_v35 = vrot.slane %v474_v28, 1  ;;  %v502_v44 = vrot.slane %v496_v36, 1  ;;  %v475_v46 = vmul.f32 %v472_v26, %v2351_v29  ;;  %v501_v48 = vrot.slane %v495_v39, 1 }
 0x110   : > { %v459_v34 = vsel %vm438_vm3, %v457_v30, %v458_v27  ;;  %v460_v45 = vrot.slane %v453_v37, 1  ;;  %v524_v50 = vrot.slane %v518_v42, 1  ;;  %v540_v51 = vmul.f32 %v538_v49, %v2323_v11 }
 0x111   : > { %v481_v43 = vsel %vm438_vm3, %v479_v38, %v480_v35  ;;  %v503_v52 = vsel %vm438_vm3, %v501_v48, %v502_v44  ;;  %v482_v54 = vrot.slane %v475_v46, 1  ;;  %v497_v55 = vmul.f32 %v494_v33, %v2351_v29 }
 0x112   : > { %391 = vrot.lane.b32.xlu0 %v387_v15, %s2047_s1  ;;  %363 = vrot.lane.b32.xlu1 %v358_v16, %s2044_s16  ;;  %v461_v53 = vsel %vm438_vm3, %v458_v27, %v460_v45  ;;  %v523_v56 = vrot.slane %v517_v47, 1  ;;  %v546_v59 = vrot.slane %v540_v51, 1  ;;  %v562_v63 = vmul.f32 %v560_v60, %v2323_v11 }
 0x113   : > { %v483_v61 = vsel %vm438_vm3, %v480_v35, %v482_v54  ;;  %v504_v62 = vrot.slane %v497_v55, 1  ;;  %v519_v0 = vmul.f32 %v516_v40, %v2351_v29  ;;  %v545_v2 = vrot.slane %v539_v57, 1 }
 0x114   : > { %v525_v58 = vsel %vm438_vm3, %v523_v56, %v524_v50  ;;  %v603_v6 = vmul.f32 %v601_v4, %v2323_v11  ;;  %v568_v9 = vrot.slane %v562_v63, 1  ;;  %v541_v12 = vmul.f32 %v538_v49, %v2351_v29 }
 0x115   : > { %v547_v5 = vsel %vm438_vm3, %v545_v2, %v546_v59  ;;  %v505_v8 = vsel %vm438_vm3, %v502_v44, %v504_v62  ;;  %v526_v10 = vrot.slane %v519_v0, 1  ;;  %v567_v13 = vrot.slane %v561_v3, 1 }
 0x116   : > { %406 = vrot.lane.b32.xlu0 %v402_v18, %s2048_s12  ;;  %378 = vrot.lane.b32.xlu1 %v373_v19, %s2046_s10  ;;  %v602_v14 = vmul.f32 %v601_v4, %v2312_v7  ;;  %v623_v15 = vstv %s622_s7  ;;  %v609_v16 = vrot.slane %v603_v6, 2  ;;  %v548_v20 = vrot.slane %v541_v12, 1  ;;  %s751_s7 = sld [smem:[#allocation8 + %s750_s11]]  ;;  %s860_s11 = sadd.s32 27, %s2298_s30 }
 0x117   : > { %v625_v17 = vmul.f32 %v623_v15, %v2323_v11  ;;  %v569_v18 = vsel %vm438_vm3, %v567_v13, %v568_v9  ;;  %v527_v19 = vsel %vm438_vm3, %v524_v50, %v526_v10  ;;  %v563_v21 = vmul.f32 %v560_v60, %v2351_v29 }
 0x118   : > { %v624_v22 = vmul.f32 %v623_v15, %v2312_v7  ;;  %v608_v23 = vrot.slane %v602_v14, 2  ;;  %v549_v28 = vsel %vm438_vm3, %v546_v59, %v548_v20  ;;  %v604_v31 = vmul.f32 %v601_v4, %v2351_v29 }
 0x119   : > { %v570_v30 = vrot.slane %v563_v21, 1  ;;  %v667_v36 = vstv %s666_s6  ;;  %v626_v40 = vmul.f32 %v623_v15, %v2351_v29  ;;  %s795_s6 = sld [smem:[#allocation8 + %s794_s15]]  ;;  %s923_s15 = sadd.s32 30, %s2298_s30 }
 0x11a   : > { %421 = vrot.lane.b32.xlu0 %v417_v24, %s2049_s14  ;;  %393 = vrot.lane.b32.xlu1 %v388_v25, %s2047_s1  ;;  %v645_v24 = vstv %s644_s13  ;;  %v631_v25 = vrot.slane %v625_v17, 2  ;;  %v610_v27 = vsel %vm589_vm4, %v608_v23, %v609_v16  ;;  %v611_v38 = vrot.slane %v604_v31, 2  ;;  %s773_s13 = sld [smem:[#allocation8 + %s772_s8]]  ;;  %s901_s8 = sadd.s32 29, %s2298_s30 }
 0x11b   : > { %v647_v26 = vmul.f32 %v645_v24, %v2323_v11  ;;  %v646_v33 = vmul.f32 %v645_v24, %v2312_v7  ;;  %v571_v37 = vsel %vm438_vm3, %v568_v9, %v570_v30  ;;  %v669_v39 = vmul.f32 %v667_v36, %v2323_v11 }
 0x11c   : > { %v668_v42 = vmul.f32 %v667_v36, %v2312_v7  ;;  %v612_v46 = vsel %vm589_vm4, %v609_v16, %v611_v38  ;;  %v633_v48 = vrot.slane %v626_v40, 2  ;;  %v648_v49 = vmul.f32 %v645_v24, %v2351_v29 }
 0x11d   : > { %v653_v35 = vrot.slane %v647_v26, 2  ;;  %v675_v47 = vrot.slane %v669_v39, 2  ;;  %v752_v63 = vstv %s751_s7  ;;  %s861_s7 = sld [smem:[#allocation8 + %s860_s11]]  ;;  %s989_s11 = sadd.s32 33, %s2298_s30 }
 0x11e   : > { %462 = vrot.lane.b32.xlu0 %v459_v34, %s2045_s17  ;;  %408 = vrot.lane.b32.xlu1 %v403_v32, %s2048_s12  ;;  %v630_v32 = vrot.slane %v624_v22, 2  ;;  %v674_v51 = vrot.slane %v668_v42, 2  ;;  %v634_v56 = vsel %vm589_vm4, %v631_v25, %v633_v48  ;;  %v655_v57 = vrot.slane %v648_v49, 2 }
 0x11f   : > { %v754_v3 = vmul.f32 %v752_v63, %v2323_v11  ;;  %v753_v6 = vmul.f32 %v752_v63, %v2312_v7  ;;  %v755_v24 = vmul.f32 %v752_v63, %v2351_v29 }
 0x120   : > { %v632_v34 = vsel %vm589_vm4, %v630_v32, %v631_v25  ;;  %v676_v55 = vsel %vm589_vm4, %v674_v51, %v675_v47  ;;  %v656_v0 = vsel %vm589_vm4, %v653_v35, %v655_v57 }
 0x121   : > { %v760_v13 = vrot.slane %v754_v3, 3  ;;  %v759_v17 = vrot.slane %v753_v6, 3  ;;  %v762_v32 = vrot.slane %v755_v24, 3 }
 0x122   : > { %484 = vrot.lane.b32.xlu0 %v481_v43, %s2044_s16  ;;  %423 = vrot.lane.b32.xlu1 %v418_v41, %s2049_s14  ;;  %v652_v41 = vrot.slane %v646_v33, 2  ;;  %v689_v43 = vstv %s688_s18  ;;  %s817_s18 = sld [smem:[#allocation8 + %s816_s26]]  ;;  %s945_s26 = sadd.s32 31, %s2298_s30 }
 0x123   : > { %v691_v45 = vmul.f32 %v689_v43, %v2323_v11  ;;  %v690_v50 = vmul.f32 %v689_v43, %v2312_v7  ;;  %v692_v4 = vmul.f32 %v689_v43, %v2351_v29  ;;  %v761_v21 = vsel %vm740_vm5, %v759_v17, %v760_v13 }
 0x124   : > { %v654_v44 = vsel %vm589_vm4, %v652_v41, %v653_v35  ;;  %v763_v40 = vsel %vm740_vm5, %v760_v13, %v762_v32 }
 0x125   : > { %v696_v59 = vrot.slane %v690_v50, 2  ;;  %v699_v14 = vrot.slane %v692_v4, 2 }
 0x126   : > { %506 = vrot.lane.b32.xlu0 %v503_v52, %s2046_s10  ;;  %464 = vrot.lane.b32.xlu1 %v461_v53, %s2045_s17  ;;  %v711_v52 = vstv %s710_s29  ;;  %v697_v53 = vrot.slane %v691_v45, 2  ;;  %s839_s29 = sld [smem:[#allocation8 + %s838_s28]]  ;;  %s967_s28 = sadd.s32 32, %s2298_s30 }
 0x127   : > { %v713_v54 = vmul.f32 %v711_v52, %v2323_v11  ;;  %v712_v60 = vmul.f32 %v711_v52, %v2312_v7  ;;  %v714_v15 = vmul.f32 %v711_v52, %v2351_v29 }
 0x128   : > { %v700_v22 = vsel %vm589_vm4, %v697_v53, %v699_v14  ;;  %v818_v30 = vstv %s817_s18  ;;  %s946_s18 = sld [smem:[#allocation8 + %s945_s26]]  ;;  %s1074_s26 = sadd.s32 37, %s2298_s30 }
 0x129   : > { %v719_v62 = vrot.slane %v713_v54, 2  ;;  %v721_v23 = vrot.slane %v714_v15, 2  ;;  %v820_v33 = vmul.f32 %v818_v30, %v2323_v11  ;;  %v821_v52 = vmul.f32 %v818_v30, %v2351_v29 }
 0x12a   : > { %528 = vrot.lane.b32.xlu0 %v525_v58, %s2047_s1  ;;  %486 = vrot.lane.b32.xlu1 %v483_v61, %s2044_s16  ;;  %v670_v58 = vmul.f32 %v667_v36, %v2351_v29  ;;  %v698_v61 = vsel %vm589_vm4, %v696_v59, %v697_v53  ;;  %v819_v36 = vmul.f32 %v818_v30, %v2312_v7 }
 0x12b   : > { %v722_v31 = vsel %vm589_vm4, %v719_v62, %v721_v23  ;;  %v826_v41 = vrot.slane %v820_v33, 3  ;;  %v828_v59 = vrot.slane %v821_v52, 3 }
 0x12c   : > { %v677_v2 = vrot.slane %v670_v58, 2  ;;  %v825_v45 = vrot.slane %v819_v36, 3 }
 0x12d   : > { %v829_v4 = vsel %vm740_vm5, %v826_v41, %v828_v59 }
 0x12e   : > { %550 = vrot.lane.b32.xlu0 %v547_v5, %s2048_s12  ;;  %508 = vrot.lane.b32.xlu1 %v505_v8, %s2046_s10  ;;  %v718_v5 = vrot.slane %v712_v60, 2  ;;  %v774_v8 = vstv %s773_s13  ;;  %v678_v12 = vsel %vm589_vm4, %v675_v47, %v677_v2  ;;  %s902_s13 = sld [smem:[#allocation8 + %s901_s8]]  ;;  %v827_v49 = vsel %vm740_vm5, %v825_v45, %v826_v41  ;;  %s1011_s8 = sadd.s32 34, %s2298_s30 }
 0x12f   : > { %v776_v10 = vmul.f32 %v774_v8, %v2323_v11  ;;  %v775_v16 = vmul.f32 %v774_v8, %v2312_v7 }
 0x130   : > { %v720_v9 = vsel %vm589_vm4, %v718_v5, %v719_v62 }
 0x131   : > { %v781_v25 = vrot.slane %v775_v16, 3 }
 0x132   : > { %572 = vrot.lane.b32.xlu0 %v569_v18, %s2049_s14  ;;  %530 = vrot.lane.b32.xlu1 %v527_v19, %s2047_s1  ;;  %v796_v18 = vstv %s795_s6  ;;  %v782_v19 = vrot.slane %v776_v10, 3  ;;  %s924_s6 = sld [smem:[#allocation8 + %s923_s15]]  ;;  %s1052_s15 = sadd.s32 36, %s2298_s30 }
 0x133   : > { %v798_v20 = vmul.f32 %v796_v18, %v2323_v11  ;;  %v797_v26 = vmul.f32 %v796_v18, %v2312_v7  ;;  %v799_v43 = vmul.f32 %v796_v18, %v2351_v29 }
 0x134   : > { %v903_v57 = vstv %s902_s13  ;;  %s1012_s13 = sld [smem:[#allocation8 + %s1011_s8]] }
 0x135   : > { %v803_v35 = vrot.slane %v797_v26, 3  ;;  %v806_v51 = vrot.slane %v799_v43, 3  ;;  %v905_v60 = vmul.f32 %v903_v57, %v2323_v11  ;;  %v904_v63 = vmul.f32 %v903_v57, %v2312_v7 }
 0x136   : > { %613 = vrot.lane.b32.xlu0 %v610_v27, %s2045_s17  ;;  %552 = vrot.lane.b32.xlu1 %v549_v28, %s2048_s12  ;;  %v783_v27 = vsel %vm740_vm5, %v781_v25, %v782_v19  ;;  %v804_v28 = vrot.slane %v798_v20, 3  ;;  %v906_v18 = vmul.f32 %v903_v57, %v2351_v29 }
 0x137   : > { %v911_v5 = vrot.slane %v905_v60, 4  ;;  %v910_v10 = vrot.slane %v904_v63, 4 }
 0x138   : > { %v805_v38 = vsel %vm740_vm5, %v803_v35, %v804_v28  ;;  %v807_v58 = vsel %vm740_vm5, %v804_v28, %v806_v51  ;;  %v913_v25 = vrot.slane %v906_v18, 4 }
 0x139   : > { %v912_v15 = vsel %vm891_vm6, %v910_v10, %v911_v5 }
 0x13a   : > { %635 = vrot.lane.b32.xlu0 %v632_v34, %s2044_s16  ;;  %574 = vrot.lane.b32.xlu1 %v571_v37, %s2049_s14  ;;  %v777_v34 = vmul.f32 %v774_v8, %v2351_v29  ;;  %v840_v37 = vstv %s839_s29  ;;  %s968_s29 = sld [smem:[#allocation8 + %s967_s28]] }
 0x13b   : > { %v842_v39 = vmul.f32 %v840_v37, %v2323_v11  ;;  %s1075_s28 = sld [smem:[#allocation8 + %s1074_s26]] }
 0x13c   : > { %v784_v42 = vrot.slane %v777_v34, 3  ;;  %v914_v34 = vsel %vm891_vm6, %v911_v5, %v913_v25 }
 0x13d   : > { %v848_v47 = vrot.slane %v842_v39, 3 }
 0x13e   : > { %657 = vrot.lane.b32.xlu0 %v654_v44, %s2046_s10  ;;  %615 = vrot.lane.b32.xlu1 %v612_v46, %s2045_s17  ;;  %v841_v44 = vmul.f32 %v840_v37, %v2312_v7  ;;  %v862_v46 = vstv %s861_s7  ;;  %v785_v50 = vsel %vm740_vm5, %v782_v19, %v784_v42  ;;  %s990_s7 = sld [smem:[#allocation8 + %s989_s11]] }
 0x13f   : > { %v864_v48 = vmul.f32 %v862_v46, %v2323_v11  ;;  %v863_v54 = vmul.f32 %v862_v46, %v2312_v7  ;;  %v865_v8 = vmul.f32 %v862_v46, %v2351_v29 }
 0x140   : > { %v847_v53 = vrot.slane %v841_v44, 3  ;;  %v969_v23 = vstv %s968_s29  ;;  %s1096_s29 = sadd.s32 38, %s2298_s30 }
 0x141   : > { %v869_v62 = vrot.slane %v863_v54, 3  ;;  %v872_v17 = vrot.slane %v865_v8, 3  ;;  %v971_v26 = vmul.f32 %v969_v23, %v2323_v11  ;;  %v970_v30 = vmul.f32 %v969_v23, %v2312_v7  ;;  %s1097_s11 = sld [smem:[#allocation8 + %s1096_s29]]  ;;  %s1225_s29 = sadd.s32 44, %s2298_s30 }
 0x142   : > { %679 = vrot.lane.b32.xlu0 %v676_v55, %s2047_s1  ;;  %637 = vrot.lane.b32.xlu1 %v634_v56, %s2044_s16  ;;  %v849_v55 = vsel %vm740_vm5, %v847_v53, %v848_v47  ;;  %v870_v56 = vrot.slane %v864_v48, 3  ;;  %v972_v46 = vmul.f32 %v969_v23, %v2351_v29 }
 0x143   : > { %v977_v35 = vrot.slane %v971_v26, 4 }
 0x144   : > { %v871_v2 = vsel %vm740_vm5, %v869_v62, %v870_v56  ;;  %v873_v24 = vsel %vm740_vm5, %v870_v56, %v872_v17  ;;  %v979_v54 = vrot.slane %v972_v46, 4 }
 0x146   : > { %701 = vrot.lane.b32.xlu0 %v698_v61, %s2048_s12  ;;  %659 = vrot.lane.b32.xlu1 %v656_v0, %s2046_s10  ;;  %v843_v61 = vmul.f32 %v840_v37, %v2351_v29  ;;  %v925_v0 = vstv %s924_s6  ;;  %s1053_s6 = sld [smem:[#allocation8 + %s1052_s15]]  ;;  %v980_v62 = vsel %vm891_vm6, %v977_v35, %v979_v54 }
 0x147   : > { %v927_v3 = vmul.f32 %v925_v0, %v2323_v11 }
 0x148   : > { %v850_v6 = vrot.slane %v843_v61, 3  ;;  %v1076_v61 = vstv %s1075_s28 }
 0x149   : > { %v933_v13 = vrot.slane %v927_v3, 4  ;;  %v1077_v5 = vmul.f32 %v1076_v61, %v2312_v7 }
 0x14a   : > { %723 = vrot.lane.b32.xlu0 %v720_v9, %s2049_s14  ;;  %681 = vrot.lane.b32.xlu1 %v678_v12, %s2047_s1  ;;  %v926_v9 = vmul.f32 %v925_v0, %v2312_v7  ;;  %v947_v12 = vstv %s946_s18  ;;  %v851_v16 = vsel %vm740_vm5, %v848_v47, %v850_v6  ;;  %s2527_s18 = sld [smem:[#allocation8 + %s2298_s30]]  ;;  %v1098_v6 = vstv %s1097_s11 }
 0x14b   : > { %v949_v14 = vmul.f32 %v947_v12, %v2323_v11  ;;  %v948_v20 = vmul.f32 %v947_v12, %v2312_v7  ;;  %v950_v37 = vmul.f32 %v947_v12, %v2351_v29  ;;  %v2570_v12 = vmul.f32 %v1098_v6, %v2323_v11  ;;  %s2610_s11 = sld [smem:[#allocation8 + %s1225_s29]]  ;;  %s1313_s29 = sadd.s32 48, %s2298_s30 }
 0x14c   : > { %v932_v19 = vrot.slane %v926_v9, 4  ;;  %v1099_v18 = vmul.f32 %v1098_v6, %v2312_v7 }
 0x14d   : > { %v954_v28 = vrot.slane %v948_v20, 4  ;;  %v957_v45 = vrot.slane %v950_v37, 4  ;;  %v1083_v20 = vrot.slane %v1077_v5, 5  ;;  %v1106_v25 = vrot.slane %v2570_v12, 5 }
 0x14e   : > { %764 = vrot.lane.b32.xlu0 %v761_v21, %s2045_s17  ;;  %703 = vrot.lane.b32.xlu1 %v700_v22, %s2048_s12  ;;  %v934_v21 = vsel %vm891_vm6, %v932_v19, %v933_v13  ;;  %v955_v22 = vrot.slane %v949_v14, 4 }
 0x150   : > { %v956_v32 = vsel %vm891_vm6, %v954_v28, %v955_v22  ;;  %v958_v53 = vsel %vm891_vm6, %v955_v22, %v957_v45 }
 0x151   : > { %v1227_v12 = vstv %s2610_s11  ;;  %s2687_s11 = sld [smem:[#allocation8 + %s1313_s29]] }
 0x152   : > { %786 = vrot.lane.b32.xlu0 %v783_v27, %s2044_s16  ;;  %725 = vrot.lane.b32.xlu1 %v722_v31, %s2049_s14  ;;  %v928_v27 = vmul.f32 %v925_v0, %v2351_v29  ;;  %v991_v31 = vstv %s990_s7  ;;  %s1118_s7 = sadd.s32 39, %s2298_s30  ;;  %v2559_v0 = vmul.f32 %v1076_v61, %v2323_v11 }
 0x153   : > { %v2518_v33 = vmul.f32 %v991_v31, %v2323_v11  ;;  %v992_v39 = vmul.f32 %v991_v31, %v2312_v7  ;;  %s2552_s8 = sld [smem:[#allocation8 + %s1118_s7]]  ;;  %s429_s7 = sadd.s32 7, %s2298_s30 }
 0x154   : > { %v935_v36 = vrot.slane %v928_v27, 4 }
 0x155   : > { %v999_v41 = vrot.slane %v2518_v33, 4  ;;  %v998_v48 = vrot.slane %v992_v39, 4  ;;  %v1105_v33 = vrot.slane %v1099_v18, 5 }
 0x156   : > { %808 = vrot.lane.b32.xlu0 %v805_v38, %s2046_s10  ;;  %766 = vrot.lane.b32.xlu1 %v763_v40, %s2045_s17  ;;  %v976_v38 = vrot.slane %v970_v30, 4  ;;  %v1013_v40 = vstv %s1012_s13  ;;  %v936_v44 = vsel %vm891_vm6, %v933_v13, %v935_v36  ;;  %s1140_s13 = sadd.s32 40, %s2298_s30 }
 0x157   : > { %v2531_v42 = vmul.f32 %v1013_v40, %v2323_v11  ;;  %v1014_v47 = vmul.f32 %v1013_v40, %v2312_v7  ;;  %v1000_v52 = vsel %vm891_vm6, %v998_v48, %v999_v41  ;;  %s2566_s15 = sld [smem:[#allocation8 + %s1140_s13]]  ;;  %v1107_v39 = vsel %vm1042_vm7, %v1105_v33, %v1106_v25 }
 0x158   : > { %v978_v43 = vsel %vm891_vm6, %v976_v38, %v977_v35  ;;  %s2626_s13 = sld [smem:[#allocation8 + %s429_s7]]  ;;  %s580_s7 = sadd.s32 14, %s2298_s30 }
 0x159   : > { %v1020_v56 = vrot.slane %v1014_v47, 4 }
 0x15a   : > { %830 = vrot.lane.b32.xlu0 %v827_v49, %s2047_s1  ;;  %788 = vrot.lane.b32.xlu1 %v785_v50, %s2044_s16  ;;  %v1054_v49 = vstv %s1053_s6  ;;  %v1021_v50 = vrot.slane %v2531_v42, 4  ;;  %s1162_s6 = sadd.s32 41, %s2298_s30  ;;  %v1101_v42 = vmul.f32 %v1098_v6, %v2351_v29 }
 0x15b   : > { %v2542_v51 = vmul.f32 %v1054_v49, %v2323_v11  ;;  %v1055_v57 = vmul.f32 %v1054_v49, %v2312_v7  ;;  %v1057_v13 = vmul.f32 %v1054_v49, %v2351_v29  ;;  %s2585_s26 = sld [smem:[#allocation8 + %s1162_s6]]  ;;  %s1269_s6 = sadd.s32 46, %s2298_s30 }
 0x15c   : > { %v1022_v59 = vsel %vm891_vm6, %v1020_v56, %v1021_v50 }
 0x15d   : > { %v1062_v60 = vrot.slane %v2542_v51, 5  ;;  %v1061_v3 = vrot.slane %v1055_v57, 5  ;;  %v1064_v26 = vrot.slane %v1057_v13, 5  ;;  %v1142_v36 = vstv %s2566_s15 }
 0x15e   : > { %852 = vrot.lane.b32.xlu0 %v849_v55, %s2048_s12  ;;  %810 = vrot.lane.b32.xlu1 %v807_v58, %s2046_s10  ;;  %v994_v55 = vmul.f32 %v991_v31, %v2351_v29  ;;  %v336_v58 = vstv %s2527_s18  ;;  %s1203_s18 = sadd.s32 43, %s2298_s30  ;;  %v1143_v48 = vmul.f32 %v1142_v36, %v2312_v7 }
 0x15f   : > { %v1063_v10 = vsel %vm1042_vm7, %v1061_v3, %v1062_v60  ;;  %v338_v23 = vmul.f32 %v336_v58, %v2323_v11  ;;  %s2595_s28 = sld [smem:[#allocation8 + %s1203_s18]]  ;;  %v1065_v45 = vsel %vm1042_vm7, %v1062_v60, %v1064_v26  ;;  %s1291_s18 = sadd.s32 47, %s2298_s30 }
 0x160   : > { %v1001_v63 = vrot.slane %v994_v55, 4 }
 0x161   : > { %v1164_v54 = vstv %s2585_s26  ;;  %s2646_s26 = sld [smem:[#allocation8 + %s1269_s6]]  ;;  %s1184_s6 = sadd.s32 42, %s2298_s30 }
 0x162   : > { %874 = vrot.lane.b32.xlu0 %v871_v2, %s2049_s14  ;;  %832 = vrot.lane.b32.xlu1 %v829_v4, %s2047_s1  ;;  %v1016_v2 = vmul.f32 %v1013_v40, %v2351_v29  ;;  %v337_v4 = vmul.f32 %v336_v58, %v2312_v7  ;;  %v2620_v57 = vmul.f32 %v1164_v54, %v2323_v11 }
 0x163   : > { %v1165_v60 = vmul.f32 %v1164_v54, %v2312_v7 }
 0x164   : > { %v1023_v17 = vrot.slane %v1016_v2, 4  ;;  %v1172_v5 = vrot.slane %v2620_v57, 5 }
 0x166   : > { %915 = vrot.lane.b32.xlu0 %v912_v15, %s2045_s17  ;;  %854 = vrot.lane.b32.xlu1 %v851_v16, %s2048_s12  ;;  %v1002_v15 = vsel %vm891_vm6, %v999_v41, %v1001_v63  ;;  %v1084_v16 = vrot.slane %v2559_v0, 5  ;;  %v1024_v31 = vsel %vm891_vm6, %v1021_v50, %v1023_v17  ;;  %v2600_v41 = vmul.f32 %v1142_v36, %v2323_v11 }
 0x168   : > { %v1085_v30 = vsel %vm1042_vm7, %v1083_v20, %v1084_v16  ;;  %v1167_v20 = vmul.f32 %v1164_v54, %v2351_v29 }
 0x16a   : > { %937 = vrot.lane.b32.xlu0 %v934_v21, %s2044_s16  ;;  %876 = vrot.lane.b32.xlu1 %v873_v24, %s2049_s14  ;;  %v1120_v21 = vstv %s2552_s8  ;;  %s1247_s8 = sadd.s32 45, %s2298_s30 }
 0x16b   : > { %v2583_v27 = vmul.f32 %v1120_v21, %v2323_v11  ;;  %v1123_v58 = vmul.f32 %v1120_v21, %v2351_v29  ;;  %s2635_s15 = sld [smem:[#allocation8 + %s1247_s8]] }
 0x16c   : > { %s2704_s8 = sld [smem:[#allocation8 + %s580_s7]] }
 0x16d   : > { %v1128_v40 = vrot.slane %v2583_v27, 5  ;;  %v1130_v6 = vrot.slane %v1123_v58, 5 }
 0x16e   : > { %959 = vrot.lane.b32.xlu0 %v956_v32, %s2046_s10  ;;  %917 = vrot.lane.b32.xlu1 %v914_v34, %s2045_s17  ;;  %v1079_v32 = vmul.f32 %v1076_v61, %v2351_v29  ;;  %v1121_v34 = vmul.f32 %v1120_v21, %v2312_v7  ;;  %v1205_v61 = vstv %s2595_s28  ;;  %s2664_s28 = sld [smem:[#allocation8 + %s1291_s18]]  ;;  %s2050_s18 = smov 1  }
 0x16f   : > { %v2633_v3 = vmul.f32 %v1205_v61, %v2323_v11  ;;  %v1131_v18 = vsel %vm1042_vm7, %v1128_v40, %v1130_v6  ;;  %v1315_v6 = vstv %s2687_s11 }
 0x170   : > { %v1086_v46 = vrot.slane %v1079_v32, 5  ;;  %v1127_v47 = vrot.slane %v1121_v34, 5  ;;  %v1174_v32 = vrot.slane %v1167_v20, 5  ;;  %v1208_v34 = vmul.f32 %v1205_v61, %v2351_v29 }
 0x172   : > { %981 = vrot.lane.b32.xlu0 %v978_v43, %s2047_s1  ;;  %939 = vrot.lane.b32.xlu1 %v936_v44, %s2044_s16  ;;  %v1129_v51 = vsel %vm1042_vm7, %v1127_v47, %v1128_v40  ;;  %v1087_v56 = vsel %vm1042_vm7, %v1084_v16, %v1086_v46  ;;  %v2654_v16 = vmul.f32 %v1227_v12, %v2323_v11 }
 0x173   : > { %v1230_v46 = vmul.f32 %v1227_v12, %v2351_v29  ;;  %v1175_v47 = vsel %vm1042_vm7, %v1172_v5, %v1174_v32 }
 0x174   : > { %v1293_v54 = vstv %s2664_s28  ;;  %s2791_s28 = smul.u32 9, %s2017_s21 }
 0x176   : > { %1003 = vrot.lane.b32.xlu0 %v1000_v52, %s2048_s12  ;;  %961 = vrot.lane.b32.xlu1 %v958_v53, %s2046_s10  ;;  %v1150_v52 = vrot.slane %v2600_v41, 5  ;;  %v1108_v53 = vrot.slane %v1101_v42, 5  ;;  %s1363_s29 = sadd.s32 1, %s2791_s28  ;;  %s1378_s7 = sadd.s32 2, %s2791_s28 }
 0x177   : > { %s2794_s11 = sld [smem:[#allocation11 + %s1363_s29]]  ;;  %s1495_s29 = sadd.s32 8, %s2791_s28 }
 0x178   : > { %v1109_v2 = vsel %vm1042_vm7, %v1106_v25, %v1108_v53 }
 0x17a   : > { %1025 = vrot.lane.b32.xlu0 %v1022_v59, %s2049_s14  ;;  %983 = vrot.lane.b32.xlu1 %v980_v62, %s2047_s1  ;;  %v1149_v59 = vrot.slane %v1143_v48, 5 }
 0x17c   : > { %v362_v8 = vpop.permute.xlu0 %361  ;;  %v347_v9 = vpop.permute.xlu1 %346  ;;  %v1151_v0 = vsel %vm1042_vm7, %v1149_v59, %v1150_v52  ;;  %v1237_v59 = vrot.slane %v1230_v46, 6 }
 0x17d   : > { %v352_v14 = vadd.f32 %v347_v9, %v337_v4  ;;  %v1206_v9 = vmul.f32 %v1205_v61, %v2312_v7 }
 0x17e   : > { %1066 = vrot.lane.b32.xlu0 %v1063_v10, %s2045_s17  ;;  %1005 = vrot.lane.b32.xlu1 %v1002_v15, %s2048_s12  ;;  %v1171_v10 = vrot.slane %v1165_v60, 5  ;;  %v1213_v15 = vrot.slane %v2633_v3, 6  ;;  %v2712_v60 = vmul.f32 %v1293_v54, %v2323_v11 }
 0x17f   : > { %v367_v19 = vadd.f32 %v362_v8, %v352_v14  ;;  %v1145_v8 = vmul.f32 %v1142_v36, %v2351_v29  ;;  %v1212_v21 = vrot.slane %v1206_v9, 6 }
 0x180   : > { %v377_v22 = vpop.permute.xlu0 %376  ;;  %v349_v24 = vpop.permute.xlu1 %348  ;;  %v1173_v17 = vsel %vm1042_vm7, %v1171_v10, %v1172_v5 }
 0x181   : > { %v382_v28 = vadd.f32 %v377_v22, %v367_v19  ;;  %v353_v35 = vadd.f32 %v349_v24, %v338_v23  ;;  %v1152_v19 = vrot.slane %v1145_v8, 5  ;;  %v1228_v22 = vmul.f32 %v1227_v12, %v2312_v7 }
 0x182   : > { %1088 = vrot.lane.b32.xlu0 %v1085_v30, %s2044_s16  ;;  %1027 = vrot.lane.b32.xlu1 %v1024_v31, %s2049_s14  ;;  %v431_v23 = vstv %s2626_s13  ;;  %v1214_v27 = vsel %vm1193_vm8, %v1212_v21, %v1213_v15  ;;  %v1249_v30 = vstv %s2635_s15 }
 0x183   : > { %v2667_v24 = vmul.f32 %v431_v23, %v2323_v11  ;;  %v1153_v31 = vsel %vm1042_vm7, %v1150_v52, %v1152_v19  ;;  %v2677_v33 = vmul.f32 %v1249_v30, %v2323_v11  ;;  %v1234_v36 = vrot.slane %v1228_v22, 6 }
 0x184   : > { %v392_v37 = vpop.permute.xlu0 %391  ;;  %v364_v38 = vpop.permute.xlu1 %363  ;;  %v434_v52 = vmul.f32 %v431_v23, %v2351_v29 }
 0x185   : > { %v2604_v43 = vadd.f32 %v392_v37, %v382_v28  ;;  %v368_v44 = vadd.f32 %v364_v38, %v353_v35  ;;  %v1235_v28 = vrot.slane %v2654_v16, 6  ;;  %v432_v35 = vmul.f32 %v431_v23, %v2312_v7  ;;  %v2728_v16 = vld [vmem:[#allocation2 + $0x8] sm:$0xff] }
 0x186   : > { %1110 = vrot.lane.b32.xlu0 %v1107_v39, %s2046_s10  ;;  %1068 = vrot.lane.b32.xlu1 %v1065_v45, %s2045_s17  ;;  %v1250_v38 = vmul.f32 %v1249_v30, %v2312_v7  ;;  %v1271_v39 = vstv %s2646_s26  ;;  %v440_v40 = vrot.slane %v2667_v24, 1  ;;  %v1257_v48 = vrot.slane %v2677_v33, 6  ;;  %s1185_s26 = sld [smem:[#allocation8 + %s1184_s6]]  ;;  %s1473_s6 = sadd.s32 7, %s2791_s28 }
 0x187   : > { %v2694_v45 = vmul.f32 %v1271_v39, %v2323_v11  ;;  %v442_v5 = vrot.slane %v434_v52, 1  ;;  %v1238_v12 = vsel %vm1193_vm8, %v1235_v28, %v1237_v59  ;;  %v582_v23 = vstv %s2704_s8  ;;  %s1411_s8 = sadd.s32 4, %s2791_s28 }
 0x188   : > { %v2612_v49 = vpop.permute.xlu0 %406  ;;  %v379_v50 = vpop.permute.xlu1 %378  ;;  %v1256_v53 = vrot.slane %v1250_v38, 6 }
 0x189   : > { %v383_v55 = vadd.f32 %v379_v50, %v368_v44  ;;  %v412_v37 = vadd.f32 %v2612_v49, %v2604_v43  ;;  %v1236_v44 = vsel %vm1193_vm8, %v1234_v36, %v1235_v28  ;;  %v1215_v49 = vrot.slane %v1208_v34, 6 }
 0x18a   : > { %1132 = vrot.lane.b32.xlu0 %v1129_v51, %s2047_s1  ;;  %1090 = vrot.lane.b32.xlu1 %v1087_v56, %s2044_s16  ;;  %v439_v50 = vrot.slane %v432_v35, 1  ;;  %v1272_v51 = vmul.f32 %v1271_v39, %v2312_v7  ;;  %v1279_v58 = vrot.slane %v2694_v45, 6  ;;  %v1258_v7 = vsel %vm1193_vm8, %v1256_v53, %v1257_v48 }
 0x18b   : > { %v443_v24 = vsel %vm438_vm3, %v440_v40, %v442_v5  ;;  %v584_v35 = vmul.f32 %v2728_v16, %v582_v23 }
 0x18c   : > { %v422_v62 = vpop.permute.xlu0 %421  ;;  %v394_v63 = vpop.permute.xlu1 %393 }
 0x18d   : > { %v2638_v4 = vadd.f32 %v394_v63, %v383_v55  ;;  %v427_v43 = vadd.f32 %v422_v62, %v412_v37  ;;  %v441_v55 = vsel %vm438_vm3, %v439_v50, %v440_v40  ;;  %v1216_v62 = vsel %vm1193_vm8, %v1213_v15, %v1215_v49 }
 0x18e   : > { %1154 = vrot.lane.b32.xlu0 %v1151_v0, %s2048_s12  ;;  %1112 = vrot.lane.b32.xlu1 %v1109_v2, %s2046_s10  ;;  %v1252_v63 = vmul.f32 %v1249_v30, %v2351_v29  ;;  %v1278_v0 = vrot.slane %v1272_v51, 6  ;;  %v2719_v2 = vld [vmem:[#allocation2] sm:$0xff]  ;;  %v1301_v15 = vrot.slane %v2712_v60, 6  ;;  %v1296_v30 = vmul.f32 %v1293_v54, %v2351_v29 }
 0x18f   : > { %v446_v61 = vadd.f32 %v441_v55, %v427_v43  ;;  %v1294_v3 = vmul.f32 %v2719_v2, %v1293_v54  ;;  %v1316_v21 = vmul.f32 %v2719_v2, %v1315_v6  ;;  %v583_v37 = vmul.f32 %v2719_v2, %v582_v23 }
 0x190   : > { %v2648_v13 = vpop.permute.xlu0 %462  ;;  %v2650_v14 = vpop.permute.xlu1 %408  ;;  %v1280_v10 = vsel %vm1193_vm8, %v1278_v0, %v1279_v58  ;;  %v1259_v20 = vrot.slane %v1252_v63, 6  ;;  %v1303_v40 = vrot.slane %v1296_v30, 6 }
 0x191   : > { %v413_v11 = vadd.f32 %v2650_v14, %v2638_v4  ;;  %v1274_v4 = vmul.f32 %v1271_v39, %v2351_v29  ;;  %v1300_v14 = vrot.slane %v1294_v3, 6  ;;  %v590_v50 = vrot.slane %v583_v37, 2 }
 0x192   : > { %1176 = vrot.lane.b32.xlu0 %v1173_v17, %s2049_s14  ;;  %1134 = vrot.lane.b32.xlu1 %v1131_v18, %s2047_s1  ;;  %v1317_v17 = vmul.f32 %v2728_v16, %v1315_v6  ;;  %v468_v18 = vadd.f32 %v2648_v13, %v446_v61  ;;  %v1260_v33 = vsel %vm1193_vm8, %v1257_v48, %v1259_v20 }
 0x193   : > { %v1302_v13 = vsel %vm1193_vm8, %v1300_v14, %v1301_v15  ;;  %v1281_v34 = vrot.slane %v1274_v4, 6  ;;  %v1304_v53 = vsel %vm1193_vm8, %v1301_v15, %v1303_v40 }
 0x194   : > { %v2669_v25 = vpop.permute.xlu0 %484  ;;  %v424_v26 = vpop.permute.xlu1 %423 }
 0x195   : > { %v428_v19 = vadd.f32 %v424_v26, %v413_v11  ;;  %v490_v22 = vadd.f32 %v2669_v25, %v468_v18  ;;  %v1323_v26 = vrot.slane %v1317_v17, 6  ;;  %v1322_v25 = vrot.slane %v1316_v21, 6 }
 0x196   : > { %1217 = vrot.lane.b32.xlu0 %v1214_v27, %s2045_s17  ;;  %1156 = vrot.lane.b32.xlu1 %v1153_v31, %s2048_s12  ;;  %v1282_v43 = vsel %vm1193_vm8, %v1279_v58, %v1281_v34 }
 0x197   : > { %v447_v31 = vadd.f32 %v443_v24, %v428_v19  ;;  %v1324_v29 = vsel %vm1193_vm8, %v1322_v25, %v1323_v26 }
 0x198   : > { %v507_v41 = vpop.permute.xlu0 %506  ;;  %v2690_v42 = vpop.permute.xlu1 %464 }
 0x199   : > { %v512_v32 = vadd.f32 %v507_v41, %v490_v22  ;;  %v2747_v41 = vld [vmem:[#allocation2 + $0x10] sm:$0x3f]  ;;  %v469_v45 = vadd.f32 %v2690_v42, %v447_v31 }
 0x19a   : > { %1239 = vrot.lane.b32.xlu0 %v1236_v44, %s2044_s16  ;;  %1178 = vrot.lane.b32.xlu1 %v1175_v47, %s2049_s14  ;;  %v1318_v44 = vmul.f32 %v2747_v41, %v1315_v6  ;;  %v591_v47 = vrot.slane %v584_v35, 2 }
 0x19c   : > { %v529_v56 = vpop.permute.xlu0 %528  ;;  %v2708_v57 = vpop.permute.xlu1 %486  ;;  %v1325_v54 = vrot.slane %v1318_v44, 6  ;;  %v592_v55 = vsel %vm589_vm4, %v590_v50, %v591_v47 }
 0x19d   : > { %v534_v36 = vadd.f32 %v529_v56, %v512_v32  ;;  %v491_v48 = vadd.f32 %v2708_v57, %v469_v45  ;;  %v585_v56 = vmul.f32 %v2747_v41, %v582_v23 }
 0x19e   : > { %1261 = vrot.lane.b32.xlu0 %v1258_v7, %s2046_s10  ;;  %1219 = vrot.lane.b32.xlu1 %v1216_v62, %s2045_s17  ;;  %v1326_v7 = vsel %vm1193_vm8, %v1323_v26, %v1325_v54 }
 0x19f   : > { %v593_v62 = vrot.slane %v585_v56, 2 }
 0x1a0   : > { %v551_v8 = vpop.permute.xlu0 %550  ;;  %v509_v9 = vpop.permute.xlu1 %508 }
 0x1a1   : > { %v556_v46 = vadd.f32 %v551_v8, %v534_v36  ;;  %v513_v52 = vadd.f32 %v509_v9, %v491_v48  ;;  %v594_v8 = vsel %vm589_vm4, %v591_v47, %v593_v62 }
 0x1a2   : > { %1283 = vrot.lane.b32.xlu0 %v1280_v10, %s2047_s1  ;;  %1241 = vrot.lane.b32.xlu1 %v1238_v12, %s2044_s16 }
 0x1a4   : > { %v573_v27 = vpop.permute.xlu0 %572  ;;  %v531_v28 = vpop.permute.xlu1 %530 }
 0x1a5   : > { %v578_v49 = vadd.f32 %v573_v27, %v556_v46  ;;  %v535_v59 = vadd.f32 %v531_v28, %v513_v52 }
 0x1a6   : > { %1305 = vrot.lane.b32.xlu0 %v1302_v13, %s2048_s12  ;;  %1263 = vrot.lane.b32.xlu1 %v1260_v33, %s2046_s10  ;;  %s731_s10 = sadd.s32 21, %s2298_s30 }
 0x1a7   : > { %s732_s13 = sld [smem:[#allocation8 + %s731_s10]]  ;;  %v597_v58 = vadd.f32 %v592_v55, %v578_v49 }
 0x1a8   : > { %v614_v38 = vpop.permute.xlu0 %613  ;;  %v553_v39 = vpop.permute.xlu1 %552  ;;  %s2799_s10 = sld [smem:[#allocation11 + %s1378_s7]] }
 0x1a9   : > { %v557_v57 = vadd.f32 %v553_v39, %v535_v59  ;;  %v619_v63 = vadd.f32 %v614_v38, %v597_v58  ;;  %s1359_s7 = sld [smem:[#allocation11 + %s2791_s28]] }
 0x1aa   : > { %1327 = vrot.lane.b32.xlu0 %v1324_v29, %s2049_s14  ;;  %1285 = vrot.lane.b32.xlu1 %v1282_v43, %s2047_s1  ;;  %s882_s1 = sadd.s32 28, %s2298_s30 }
 0x1ac   : > { %v636_v51 = vpop.permute.xlu0 %635  ;;  %v575_v42 = vpop.permute.xlu1 %574 }
 0x1ad   : > { %v579_v0 = vadd.f32 %v575_v42, %v557_v57  ;;  %v641_v5 = vadd.f32 %v636_v51, %v619_v63  ;;  %v733_v6 = vstv %s732_s13  ;;  %s1412_s13 = sld [smem:[#allocation11 + %s1411_s8]] }
 0x1ae   : > { %1307 = vrot.lane.b32.xlu1 %v1304_v53, %s2048_s12  ;;  %v735_v9 = vmul.f32 %v2728_v16, %v733_v6  ;;  %v734_v18 = vmul.f32 %v2719_v2, %v733_v6  ;;  %v736_v13 = vmul.f32 %v2747_v41, %v733_v6  ;;  %s883_s12 = sld [smem:[#allocation8 + %s882_s1]]  ;;  %s1433_s1 = sadd.s32 5, %s2791_s28 }
 0x1af   : > { %v598_v10 = vadd.f32 %v594_v8, %v579_v0 }
 0x1b0   : > { %v658_v60 = vpop.permute.xlu0 %657  ;;  %v616_v61 = vpop.permute.xlu1 %615  ;;  %v742_v20 = vrot.slane %v735_v9, 3  ;;  %v741_v23 = vrot.slane %v734_v18, 3  ;;  %v744_v34 = vrot.slane %v736_v13, 3 }
 0x1b1   : > { %v663_v12 = vadd.f32 %v658_v60, %v641_v5  ;;  %v620_v4 = vadd.f32 %v616_v61, %v598_v10 }
 0x1b2   : > { %1329 = vrot.lane.b32.xlu1 %v1326_v7, %s2049_s14  ;;  %v743_v28 = vsel %vm740_vm5, %v741_v23, %v742_v20  ;;  %v745_v38 = vsel %vm740_vm5, %v742_v20, %v744_v34  ;;  %s1033_s14 = sadd.s32 35, %s2298_s30  ;;  %s1335_s30 = sld [smem:[#allocation9 + %s2017_s21]] }
 0x1b3   : > { %s1034_s15 = sld [smem:[#allocation8 + %s1033_s14]]  ;;  %s1455_s14 = sadd.s32 6, %s2791_s28 }
 0x1b4   : > { %v680_v3 = vpop.permute.xlu0 %679  ;;  %v638_v11 = vpop.permute.xlu1 %637  ;;  %v884_v47 = vstv %s883_s12  ;;  %s1393_s12 = sadd.s32 3, %s2791_s28  ;;  %s1694_s28 = sshll.u32 %s2021_s22, 3 }
 0x1b5   : > { %v685_v19 = vadd.f32 %v680_v3, %v663_v12  ;;  %v642_v24 = vadd.f32 %v638_v11, %v620_v4  ;;  %v886_v48 = vmul.f32 %v2728_v16, %v884_v47  ;;  %v885_v42 = vmul.f32 %v2719_v2, %v884_v47 }
 0x1b6   : > { %v887_v7 = vmul.f32 %v2747_v41, %v884_v47 }
 0x1b7   : > { %v893_v53 = vrot.slane %v886_v48, 4  ;;  %v892_v59 = vrot.slane %v885_v42, 4 }
 0x1b8   : > { %v702_v15 = vpop.permute.xlu0 %701  ;;  %v660_v17 = vpop.permute.xlu1 %659  ;;  %v895_v5 = vrot.slane %v887_v7, 4 }
 0x1b9   : > { %v707_v14 = vadd.f32 %v702_v15, %v685_v19  ;;  %v664_v26 = vadd.f32 %v660_v17, %v642_v24  ;;  %v894_v57 = vsel %vm891_vm6, %v892_v59, %v893_v53 }
 0x1ba   : > { %v896_v12 = vsel %vm891_vm6, %v893_v53, %v895_v5 }
 0x1bc   : > { %v724_v21 = vpop.permute.xlu0 %723  ;;  %v682_v22 = vpop.permute.xlu1 %681 }
 0x1bd   : > { %v729_v27 = vadd.f32 %v724_v21, %v707_v14  ;;  %v686_v33 = vadd.f32 %v682_v22, %v664_v26  ;;  %v1035_v21 = vstv %s1034_s15  ;;  %s1434_s15 = sld [smem:[#allocation11 + %s1433_s1]] }
 0x1be   : > { %v1037_v22 = vmul.f32 %v2728_v16, %v1035_v21 }
 0x1bf   : > { %v748_v30 = vadd.f32 %v743_v28, %v729_v27  ;;  %v1036_v28 = vmul.f32 %v2719_v2, %v1035_v21 }
 0x1c0   : > { %v765_v31 = vpop.permute.xlu0 %764  ;;  %v704_v32 = vpop.permute.xlu1 %703  ;;  %v1044_v26 = vrot.slane %v1037_v22, 5 }
 0x1c1   : > { %v708_v35 = vadd.f32 %v704_v32, %v686_v33  ;;  %v770_v44 = vadd.f32 %v765_v31, %v748_v30  ;;  %v1043_v34 = vrot.slane %v1036_v28, 5 }
 0x1c4   : > { %v787_v25 = vpop.permute.xlu0 %786  ;;  %v726_v36 = vpop.permute.xlu1 %725 }
 0x1c5   : > { %v730_v37 = vadd.f32 %v726_v36, %v708_v35  ;;  %v792_v43 = vadd.f32 %v787_v25, %v770_v44  ;;  %v1045_v36 = vsel %vm1042_vm7, %v1043_v34, %v1044_v26 }
 0x1c7   : > { %v749_v39 = vadd.f32 %v745_v38, %v730_v37  ;;  %v1038_v37 = vmul.f32 %v2747_v41, %v1035_v21 }
 0x1c8   : > { %v809_v29 = vpop.permute.xlu0 %808  ;;  %v767_v40 = vpop.permute.xlu1 %766 }
 0x1c9   : > { %v814_v49 = vadd.f32 %v809_v29, %v792_v43  ;;  %v771_v54 = vadd.f32 %v767_v40, %v749_v39 }
 0x1cc   : > { %v831_v45 = vpop.permute.xlu0 %830  ;;  %v789_v46 = vpop.permute.xlu1 %788 }
 0x1cd   : > { %v836_v52 = vadd.f32 %v831_v45, %v814_v49  ;;  %v793_v60 = vadd.f32 %v789_v46, %v771_v54  ;;  %v1046_v45 = vrot.slane %v1038_v37, 5 }
 0x1cf   : > { %v1047_v49 = vsel %vm1042_vm7, %v1044_v26, %v1046_v45 }
 0x1d0   : > { %v853_v50 = vpop.permute.xlu0 %852  ;;  %v811_v51 = vpop.permute.xlu1 %810 }
 0x1d1   : > { %v858_v55 = vadd.f32 %v853_v50, %v836_v52  ;;  %v815_v62 = vadd.f32 %v811_v51, %v793_v60 }
 0x1d4   : > { %v875_v56 = vpop.permute.xlu0 %874  ;;  %v833_v58 = vpop.permute.xlu1 %832 }
 0x1d5   : > { %v880_v61 = vadd.f32 %v875_v56, %v858_v55  ;;  %v837_v11 = vadd.f32 %v833_v58, %v815_v62  ;;  %v1186_v56 = vstv %s1185_s26  ;;  %s1394_s26 = sld [smem:[#allocation11 + %s1393_s12]] }
 0x1d6   : > { %v1188_v58 = vmul.f32 %v2728_v16, %v1186_v56 }
 0x1d7   : > { %v899_v63 = vadd.f32 %v894_v57, %v880_v61  ;;  %v1187_v57 = vmul.f32 %v2719_v2, %v1186_v56 }
 0x1d8   : > { %v916_v0 = vpop.permute.xlu0 %915  ;;  %v855_v3 = vpop.permute.xlu1 %854  ;;  %v1195_v62 = vrot.slane %v1188_v58, 6 }
 0x1d9   : > { %v859_v6 = vadd.f32 %v855_v3, %v837_v11  ;;  %v921_v19 = vadd.f32 %v916_v0, %v899_v63  ;;  %v1194_v5 = vrot.slane %v1187_v57, 6 }
 0x1dc   : > { %v938_v8 = vpop.permute.xlu0 %937  ;;  %v877_v9 = vpop.permute.xlu1 %876 }
 0x1dd   : > { %v881_v10 = vadd.f32 %v877_v9, %v859_v6  ;;  %v943_v14 = vadd.f32 %v938_v8, %v921_v19  ;;  %v1196_v9 = vsel %vm1193_vm8, %v1194_v5, %v1195_v62 }
 0x1df   : > { %v900_v15 = vadd.f32 %v896_v12, %v881_v10  ;;  %v1189_v10 = vmul.f32 %v2747_v41, %v1186_v56 }
 0x1e0   : > { %v960_v17 = vpop.permute.xlu0 %959  ;;  %v918_v18 = vpop.permute.xlu1 %917 }
 0x1e1   : > { %v965_v23 = vadd.f32 %v960_v17, %v943_v14  ;;  %v922_v30 = vadd.f32 %v918_v18, %v900_v15  ;;  %v1197_v2 = vrot.slane %v1189_v10, 6 }
 0x1e3   : > { %v1198_v21 = vsel %vm1193_vm8, %v1195_v62, %v1197_v2 }
 0x1e4   : > { %v982_v20 = vpop.permute.xlu0 %981  ;;  %v940_v4 = vpop.permute.xlu1 %939 }
 0x1e5   : > { %v987_v13 = vadd.f32 %v982_v20, %v965_v23  ;;  %v944_v35 = vadd.f32 %v940_v4, %v922_v30 }
 0x1e8   : > { %v1004_v24 = vpop.permute.xlu0 %1003  ;;  %v962_v27 = vpop.permute.xlu1 %961 }
 0x1e9   : > { %v1009_v31 = vadd.f32 %v1004_v24, %v987_v13  ;;  %v966_v38 = vadd.f32 %v962_v27, %v944_v35  ;;  %v1336_v35 = vstv %s1335_s30  ;;  %s1456_s30 = sld [smem:[#allocation11 + %s1455_s14]]  ;;  %s1527_s14 = scalar_lea.sflag [#allocation6], %s2272_s2 }
 0x1ec   : > { %v1026_v32 = vpop.permute.xlu0 %1025  ;;  %v984_v33 = vpop.permute.xlu1 %983 }
 0x1ed   : > { %v1031_v25 = vadd.f32 %v1026_v32, %v1009_v31  ;;  %v988_v44 = vadd.f32 %v984_v33, %v966_v38 }
 0x1ef   : > { %v1050_v39 = vadd.f32 %v1045_v36, %v1031_v25 }
 0x1f0   : > { %v1067_v29 = vpop.permute.xlu0 %1066  ;;  %v1006_v40 = vpop.permute.xlu1 %1005 }
 0x1f1   : > { %v1010_v46 = vadd.f32 %v1006_v40, %v988_v44  ;;  %v1072_v52 = vadd.f32 %v1067_v29, %v1050_v39 }
 0x1f4   : > { %v1089_v43 = vpop.permute.xlu0 %1088  ;;  %v1028_v47 = vpop.permute.xlu1 %1027 }
 0x1f5   : > { %v1032_v48 = vadd.f32 %v1028_v47, %v1010_v46  ;;  %v1094_v55 = vadd.f32 %v1089_v43, %v1072_v52  ;;  %v1413_v52 = vstv %s1412_s13 }
 0x1f7   : > { %v1051_v50 = vadd.f32 %v1047_v49, %v1032_v48  ;;  %v1365_v48 = vstv %s2794_s11  ;;  %s1496_s11 = sld [smem:[#allocation11 + %s1495_s29]] }
 0x1f8   : > { %v1111_v51 = vpop.permute.xlu0 %1110  ;;  %v1069_v42 = vpop.permute.xlu1 %1068 }
 0x1f9   : > { %v1116_v59 = vadd.f32 %v1111_v51, %v1094_v55  ;;  %v1073_v63 = vadd.f32 %v1069_v42, %v1051_v50  ;;  %v1380_v42 = vstv %s2799_s10  ;;  %v1435_v55 = vstv %s1434_s15  ;;  %s312_s10 = scalar_lea.vmem [#allocation14], %s1686_s4  ;;  %s2051_s4 = smov [#allocation14]  }
 0x1fa   : > { %s1542_s13 = sshll.u32 %s312_s10, 4  ;;  %s2861_s13 = int_to_ptr.vmem [resolvable:$true] %s1542_s13 }
 0x1fb   : > { %s1923_s15 = scalar_lea.vmem %s2861_s13, 256 }
 0x1fc   : > { %v1133_v53 = vpop.permute.xlu0 %1132  ;;  %v1091_v54 = vpop.permute.xlu1 %1090  ;;  %p1924_p8 = scmp.ne.s32.totalorder %s2861_s13, %s1923_s15 }
 0x1fd   : > { %v1138_v7 = vadd.f32 %v1133_v53, %v1116_v59  ;;  %v1095_v6 = vadd.f32 %v1091_v54, %v1073_v63  ;;  %v1395_v59 = vstv %s1394_s26 }
 0x1fe   : > { %p1925_p10 = pnand %p1924_p8, %p2211_p3 }
 0x200   : > { %v1155_v60 = vpop.permute.xlu0 %1154  ;;  %v1113_v61 = vpop.permute.xlu1 %1112  ;;  %p1926_p0 = pneg %p1925_p10 }
 0x201   : > { %v1160_v0 = vadd.f32 %v1155_v60, %v1138_v7  ;;  %v1117_v12 = vadd.f32 %v1113_v61, %v1095_v6  ;;  %v1457_v60 = vstv %s1456_s30 }
 0x204   : > { %v1177_v3 = vpop.permute.xlu0 %1176  ;;  %v1135_v11 = vpop.permute.xlu1 %1134 }
 0x205   : > { %v1182_v8 = vadd.f32 %v1177_v3, %v1160_v0  ;;  %v1139_v18 = vadd.f32 %v1135_v11, %v1117_v12 }
 0x207   : > { %v1201_v16 = vadd.f32 %v1196_v9, %v1182_v8 }
 0x208   : > { %v1218_v15 = vpop.permute.xlu0 %1217  ;;  %v1157_v17 = vpop.permute.xlu1 %1156 }
 0x209   : > { %v1161_v19 = vadd.f32 %v1157_v17, %v1139_v18  ;;  %v1223_v27 = vadd.f32 %v1218_v15, %v1201_v16  ;;  %v1497_v18 = vstv %s1496_s11 }
 0x20c   : > { %v1240_v20 = vpop.permute.xlu0 %1239  ;;  %v1179_v4 = vpop.permute.xlu1 %1178 }
 0x20d   : > { %v1183_v14 = vadd.f32 %v1179_v4, %v1161_v19  ;;  %v1245_v41 = vadd.f32 %v1240_v20, %v1223_v27 }
 0x20f   : > { %v1202_v22 = vadd.f32 %v1198_v21, %v1183_v14 }
 0x210   : > { %v1262_v23 = vpop.permute.xlu0 %1261  ;;  %v1220_v24 = vpop.permute.xlu1 %1219 }
 0x211   : > { %v1267_v26 = vadd.f32 %v1262_v23, %v1245_v41  ;;  %v1224_v33 = vadd.f32 %v1220_v24, %v1202_v22 }
 0x214   : > { %v1284_v28 = vpop.permute.xlu0 %1283  ;;  %v1242_v13 = vpop.permute.xlu1 %1241 }
 0x215   : > { %v1289_v32 = vadd.f32 %v1284_v28, %v1267_v26  ;;  %v1246_v37 = vadd.f32 %v1242_v13, %v1224_v33 }
 0x218   : > { %v1306_v30 = vpop.permute.xlu0 %1305  ;;  %v1264_v31 = vpop.permute.xlu1 %1263 }
 0x219   : > { %v1311_v34 = vadd.f32 %v1306_v30, %v1289_v32  ;;  %v1268_v39 = vadd.f32 %v1264_v31, %v1246_v37 }
 0x21c   : > { %v1328_v25 = vpop.permute.xlu0 %1327  ;;  %v1286_v36 = vpop.permute.xlu1 %1285 }
 0x21d   : > { %v1333_v38 = vadd.f32 %v1328_v25, %v1311_v34  ;;  %v1290_v44 = vadd.f32 %v1286_v36, %v1268_v39 }
 0x21f   : > { %v1337_v29 = vadd.f32 %v1336_v35, %v1333_v38 }
 0x220   : > { %v1308_v40 = vpop.permute.xlu1 %1307 }
 0x221   : > { %1346 = vrot.lane.b32.xlu0 %v1337_v29, %s2050_s18  ;;  %v1312_v45 = vadd.f32 %v1308_v40, %v1290_v44 }
 0x224   : > { %v1330_v1 = vpop.permute.xlu1 %1329 }
 0x225   : > { %v1334_v46 = vadd.f32 %v1330_v1, %v1312_v45 }
 0x227   : > { %v1338_v43 = vadd.f32 %v1336_v35, %v1334_v46 }
 0x229   : > { %1348 = vrot.lane.b32.xlu1 %v1338_v43, %s2050_s18  ;;  %s1474_s18 = sld [smem:[#allocation11 + %s1473_s6]]  ;;  %s1927_s6 = sshll.u32 %s2051_s4, 4  ;;  %s1928_s6 = int_to_ptr.vmem [resolvable:$false] %s1927_s6 }
 0x22a   : > { %s1929_s26 = scalar_lea.vmem %s1928_s6, 512  ;;  %p1930_p5 = scmp.lt.s32.totalorder %s2861_s13, %s1928_s6 }
 0x22b   : > { %p1931_p7 = scmp.lt.s32.totalorder %s1929_s26, %s1923_s15 }
 0x22d   : > { %p1932_p11 = por %p1931_p7, %p1930_p5 }
 0x22f   : > { %v1475_v0 = vstv %s1474_s18  ;;  %p1933_p1 = pnand %p1932_p11, %p1926_p0 }
 0x293   : > { %v1347_v47 = vpop.permute.xlu0 %1346 }
 0x294   : > { %1353 = vst.msk [vmem:[#allocation3 + $0x1] sm:$0xff] %vm1352_vm11, %v1347_v47 }
 0x29b   : > { %v1349_v49 = vpop.permute.xlu1 %1348  ;;  %v2806_v50 = vld [vmem:[#allocation3] sm:$0xff] }
 0x29c   : > { %1354 = vst.msk [vmem:[#allocation3 + $0x9] sm:$0xff] %vm1352_vm11, %v1349_v49  ;;  %v1366_v51 = vmul.f32 %v1365_v48, %v2806_v50  ;;  %v1381_v53 = vmul.f32 %v1380_v42, %v2806_v50  ;;  %v1414_v54 = vmul.f32 %v1413_v52, %v2806_v50  ;;  %v1436_v62 = vmul.f32 %v1435_v55, %v2806_v50 }
 0x29d   : > { %v1396_v5 = vmul.f32 %v1395_v59, %v2806_v50  ;;  %v1458_v6 = vmul.f32 %v1457_v60, %v2806_v50  ;;  %v1476_v15 = vmul.f32 %v1475_v0, %v2806_v50  ;;  %v1498_v33 = vmul.f32 %v1497_v18, %v2806_v50 }
 0x29e   : > { %1370 = vrot.lane.b32.xlu0 %v1366_v51, %s2045_s17  ;;  %v1420_v3 = vrot.slane %v1414_v54, 1  ;;  %v1442_v2 = vrot.slane %v1436_v62, 1 }
 0x29f   : > { %v1402_v20 = vrot.slane %v1396_v5, 1  ;;  %v1464_v4 = vrot.slane %v1458_v6, 2  ;;  %v1482_v32 = vrot.slane %v1476_v15, 2  ;;  %v1504_v45 = vrot.slane %v1498_v33, 2 }
 0x2a2   : > { %1385 = vrot.lane.b32.xlu0 %v1381_v53, %s2044_s16 }
 0x2a3   : > { %v2816_v56 = vld [vmem:[#allocation3 + $0x8] sm:$0xff]  ;;  %v1357_v58 = vld [vmem:[#allocation3 + $0x10] sm:$0x3] }
 0x2a4   : > { %v1367_v61 = vmul.f32 %v1365_v48, %v2816_v56  ;;  %v1415_v57 = vmul.f32 %v1413_v52, %v2816_v56  ;;  %v1437_v7 = vmul.f32 %v1435_v55, %v2816_v56  ;;  %v1416_v63 = vmul.f32 %v1413_v52, %v1357_v58 }
 0x2a5   : > { %v1382_v9 = vmul.f32 %v1380_v42, %v2816_v56  ;;  %v1477_v12 = vmul.f32 %v1475_v0, %v2816_v56  ;;  %v1438_v17 = vmul.f32 %v1435_v55, %v1357_v58  ;;  %v1397_v19 = vmul.f32 %v1395_v59, %v2816_v56 }
 0x2a6   : > { %1372 = vrot.lane.b32.xlu1 %v1367_v61, %s2045_s17  ;;  %v1421_v11 = vrot.slane %v1415_v57, 1  ;;  %v1443_v10 = vrot.slane %v1437_v7, 1  ;;  %v1423_v16 = vrot.slane %v1416_v63, 1  ;;  %v1499_v14 = vmul.f32 %v1497_v18, %v2816_v56 }
 0x2a7   : > { %v1478_v21 = vmul.f32 %v1475_v0, %v1357_v58  ;;  %v1398_v22 = vmul.f32 %v1395_v59, %v1357_v58  ;;  %v1459_v23 = vmul.f32 %v1457_v60, %v2816_v56  ;;  %v1483_v27 = vrot.slane %v1477_v12, 2 }
 0x2a8   : > { %v1422_v8 = vsel %vm438_vm3, %v1420_v3, %v1421_v11  ;;  %v1444_v24 = vsel %vm438_vm3, %v1442_v2, %v1443_v10  ;;  %v1403_v28 = vrot.slane %v1397_v19, 1  ;;  %v1460_v13 = vmul.f32 %v1457_v60, %v1357_v58 }
 0x2a9   : > { %1425 = vrot.lane.b32.xlu0 %v1422_v8, %s2045_s17  ;;  %v1424_v41 = vsel %vm438_vm3, %v1421_v11, %v1423_v16  ;;  %v1445_v26 = vrot.slane %v1438_v17, 1  ;;  %v1405_v30 = vrot.slane %v1398_v22, 1  ;;  %v1465_v31 = vrot.slane %v1459_v23, 2 }
 0x2aa   : > { %1387 = vrot.lane.b32.xlu1 %v1382_v9, %s2044_s16  ;;  %v1404_v34 = vsel %vm438_vm3, %v1402_v20, %v1403_v28  ;;  %v1467_v35 = vrot.slane %v1460_v13, 2  ;;  %v1484_v37 = vsel %vm589_vm4, %v1482_v32, %v1483_v27  ;;  %v1505_v38 = vrot.slane %v1499_v14, 2 }
 0x2ab   : > { %v1406_v25 = vsel %vm438_vm3, %v1403_v28, %v1405_v30  ;;  %v1466_v36 = vsel %vm589_vm4, %v1464_v4, %v1465_v31  ;;  %v1446_v29 = vsel %vm438_vm3, %v1443_v10, %v1445_v26  ;;  %v1485_v40 = vrot.slane %v1478_v21, 2 }
 0x2ac   : > { %v1468_v39 = vsel %vm589_vm4, %v1465_v31, %v1467_v35  ;;  %v1500_v44 = vmul.f32 %v1497_v18, %v1357_v58  ;;  %v1506_v1 = vsel %vm589_vm4, %v1504_v45, %v1505_v38  ;;  %v1360_v48 = vstv %s1359_s7 }
 0x2ad   : > { %1447 = vrot.lane.b32.xlu0 %v1444_v24, %s2044_s16  ;;  %v1486_v46 = vsel %vm589_vm4, %v1483_v27, %v1485_v40  ;;  %v1361_v51 = vmul.f32 %v1360_v48, %v2806_v50  ;;  %v1362_v58 = vmul.f32 %v1360_v48, %v2816_v56 }
 0x2ae   : > { %1427 = vrot.lane.b32.xlu1 %v1424_v41, %s2045_s17  ;;  %v1507_v43 = vrot.slane %v1500_v44, 2 }
 0x2b0   : > { %v1508_v47 = vsel %vm589_vm4, %v1505_v38, %v1507_v43 }
 0x2b1   : > { %1487 = vrot.lane.b32.xlu0 %v1484_v37, %s2045_s17 }
 0x2b2   : > { %1449 = vrot.lane.b32.xlu1 %v1446_v29, %s2044_s16 }
 0x2b5   : > { %1509 = vrot.lane.b32.xlu0 %v1506_v1, %s2044_s16 }
 0x2b6   : > { %1489 = vrot.lane.b32.xlu1 %v1486_v46, %s2045_s17  ;;  %s1693_s17 = sshll.u32 %s2017_s21, 1 }
 0x2b7   : > { %s1539_s8 = sadd.s32 %s1694_s28, %s1693_s17 }
 0x2b8   : > { %s1695_s1 = sshll.u32 %s1539_s8, 7 }
 0x2b9   : > { %s2866_s12 = scalar_lea.hbm %s2925_s5, %s1695_s1 }
 0x2ba   : > { %1511 = vrot.lane.b32.xlu1 %v1508_v47, %s2044_s16  ;;  %s1517_s16 = sld [smem:[#allocation12 + %s2017_s21]] }
 0x2c0   : > { %v1518_v56 = vstv %s1517_s16 }
 0x310   : > { %v1371_v49 = vpop.permute.xlu0 %1370 }
 0x311   : > { %v1376_v42 = vadd.f32 %v1371_v49, %v1361_v51 }
 0x314   : > { %v1386_v52 = vpop.permute.xlu0 %1385 }
 0x315   : > { %v1391_v53 = vadd.f32 %v1386_v52, %v1376_v42 }
 0x317   : > { %v1409_v54 = vadd.f32 %v1404_v34, %v1391_v53 }
 0x318   : > { %v1373_v55 = vpop.permute.xlu1 %1372 }
 0x319   : > { %v1377_v59 = vadd.f32 %v1373_v55, %v1362_v58 }
 0x31b   : > { %v1426_v60 = vpop.permute.xlu0 %1425 }
 0x31c   : > { %v1388_v61 = vpop.permute.xlu1 %1387  ;;  %v1431_v7 = vadd.f32 %v1426_v60, %v1409_v54 }
 0x31d   : > { %v1392_v57 = vadd.f32 %v1388_v61, %v1377_v59 }
 0x31f   : > { %v1448_v62 = vpop.permute.xlu0 %1447  ;;  %v1410_v63 = vadd.f32 %v1406_v25, %v1392_v57 }
 0x320   : > { %v1453_v0 = vadd.f32 %v1448_v62, %v1431_v7  ;;  %v1428_v3 = vpop.permute.xlu1 %1427 }
 0x321   : > { %v1432_v11 = vadd.f32 %v1428_v3, %v1410_v63 }
 0x322   : > { %v1471_v50 = vadd.f32 %v1466_v36, %v1453_v0 }
 0x323   : > { %v1488_v5 = vpop.permute.xlu0 %1487 }
 0x324   : > { %v1450_v6 = vpop.permute.xlu1 %1449  ;;  %v1493_v9 = vadd.f32 %v1488_v5, %v1471_v50 }
 0x325   : > { %v1454_v8 = vadd.f32 %v1450_v6, %v1432_v11 }
 0x327   : > { %v1510_v10 = vpop.permute.xlu0 %1509  ;;  %v1472_v12 = vadd.f32 %v1468_v39, %v1454_v8 }
 0x328   : > { %v1515_v16 = vadd.f32 %v1510_v10, %v1493_v9  ;;  %v1490_v15 = vpop.permute.xlu1 %1489 }
 0x329   : > { %v1494_v18 = vadd.f32 %v1490_v15, %v1472_v12 }
 0x32a   : > { %v1519_v17 = vadd.f32 %v1518_v56, %v1515_v16 }
 0x32c   : > { %v1521_v2 = vmax.f32 %v1519_v17, 0.0  ;;  %v1512_v19 = vpop.permute.xlu1 %1511 }
 0x32d   : > { %v1516_v20 = vadd.f32 %v1512_v19, %v1494_v18 }
 0x32e   : > { %1524 = vst.msk [vmem:[%s312_s10] sm:$0xff] %vm1523_vm12, %v1521_v2 }
 0x32f   : > { %v1520_v4 = vadd.f32 %v1518_v56, %v1516_v20 }
 0x331   : > { %v1522_v14 = vmax.f32 %v1520_v4, 0.0 }
 0x333   : > { %1525 = vst.msk [vmem:[%s312_s10 + $0x8] sm:$0xff] %vm1523_vm12, %v1522_v14 }
 0x334   : > { %1936 = shalt.err (!%p1933_p1)
}
 0x335   : > { %s1937_s30 = scalar_lea.hbm %s2866_s12, 256  ;;  %s1941_s11 = scalar_lea.hbm %s2925_s5, 2048 }
 0x336   : > { %p1938_p12 = scmp.ne.s32.totalorder %s2866_s12, %s1937_s30  ;;  %p1942_p13 = scmp.lt.u32.totalorder %s2866_s12, %s2925_s5 }
 0x337   : > { %p1943_p2 = scmp.lt.u32.totalorder %s1941_s11, %s1937_s30  ;;  %p1945_p8 = scmp.lt.u32.totalorder %s1937_s30, %s2866_s12 }
 0x338   : > { %p1939_p4 = pnand %p1938_p12, %p2211_p3 }
 0x339   : > { %p1944_p9 = por %p1943_p2, %p1942_p13 }
 0x33a   : > { %p1940_p6 = pneg %p1939_p4 }
 0x33b   : > { %p1946_p10 = por %p1945_p8, %p1944_p9 }
 0x33d   : > { %p1947_p0 = pnand %p1946_p10, %p1940_p6 }
 0x33f   : > { %1950 = shalt.err (!%p1947_p0)
}
 0x340   : > { %s2052_s17 = smov 128   ;;  %s2053_s28 = smov 8  }
 0x341   : > { %1716 = dma.vmem_to_hbm [thread:$0]  (%p2211_p3), %s2861_s13, 256, %s2866_s12, %s1527_s14, %s2052_s17, %s2052_s17, %s2053_s28  }
 0x342 PF: > { %s2957_s8 = sld [smem:[#allocation20_spill]]  ;;  %s2958_s10 = sld [smem:[#allocation21_spill]] }
 0x343   : > { %p1748_p5 = scmp.ge.s32.totalorder %s2033_s25, 2 }
 0x348   : > { %s1557_s1 = sand.u32 1, %s2957_s8   ;;  %p2959_p7 = scmp.ne.s32.totalorder %s2958_s10, 0 }
 0x349   : > { %s1558_s21 = scalar_lea.sflag [#allocation6], %s1557_s1 }
 0x34a   : > { %p1736_p11 = pnand %p1748_p5, %p2959_p7 }
 0x34c   : > { %2000 = dma.done.wait (!%p1736_p11), %s1558_s21, 256  }
 0x34d   : > { %2002 = vsyncadd (!%p1736_p11), %s1558_s21, 4294967040  ;;  %s24_s25 = sadd.s32 1, %s2033_s25   ;;  %s2960_s9 = sld [smem:[#allocation22_spill]] }
 0x34e   : > { %p21_p1 = scmp.ge.s32.totalorder %s24_s25, 10   ;;  %s2961_s18 = smov %s2009_s19 }
 0x34f   : > { %s2962_s19 = smov %s2013_s20  ;;  %s2963_s20 = smov %s2224_s3 }
 0x350   : > { %s2964_s21 = smov %s2025_s23  ;;  %s2965_s22 = smov %s2029_s24 }
 0x351   : > { %s2967_s24 = smov %s2973_s27  ;;  %23 = sbr.rel (!%p21_p1) target bundleno = 15 (0xf), region = 102 }
 0x353   : > { %s2966_s23 = smov %s2960_s9 }
 0x358   :  { %1563 = vsyncpa [#allocation5], 1 }
 0x359   :  { %1565 = vsyncpa [#allocation5 + $0x1], 1 }
 0x35a   :  { %1566 = vsyncpa [#allocation6], 1 }
 0x35b   :  { %1568 = vsyncpa [#allocation6 + $0x1], 1 }
 0x35c   :  { %1569 = vsyncpa [#allocation7], 1 }
 0x35d   :  { %1571 = vsyncpa [#allocation7 + $0x1], 1 }
 0x35e   :  { %1572 = vsyncpa [#allocation10], 1 }
 0x35f   :  { %1573 = vsyncpa [#allocation13], 1 }

</bundles_post_ra>
